<compile_context>
chip_gen: v7x
topology: tpu7x:2x2x1
jax: 0.10.0
libtpu: 0.0.40
codegen_flags: <defaults>
</compile_context>

<pallas_src>
import functools
import math

import jax
import jax.numpy as jnp
from jax import lax
from jax.experimental import pallas as pl
from jax.experimental.pallas import tpu as pltpu


# ------------------------------ roll helpers --------------------------------


def _roll_lane(a, shift):
    shift = shift % 128
    return a if shift == 0 else pltpu.roll(a, shift, axis=1)


def _roll_sub(a, shift):
    n = a.shape[0]
    shift = shift % n
    return a if shift == 0 else pltpu.roll(a, shift, axis=0)


# ------------------------------ fused kernel --------------------------------


def _make_ghost_kernel(*, cin, cinit, cnew, oup, ghosts_per_group, R, W, nH,
                       has_halo, out_dtype):
    f32 = jnp.float32

    def kernel(*refs):
        if has_halo:
            (xm_ref, xt_ref, xb_ref, ml_ref, mr_ref,
             pw_ref, pb_ref, dwt_ref, cb_ref, o_ref) = refs
        else:
            (xm_ref, ml_ref, mr_ref,
             pw_ref, pb_ref, dwt_ref, cb_ref, o_ref) = refs
            xt_ref = xb_ref = None

        # xm:  (cin, R, 128)  flat-spatial main tile (lane axis = 128 elems)
        # xt/xb: (cin, 8, 128) chunk blocks holding the halo rows (only nH>1)
        # ml/mr: (R, 128) f32 left/right zero-pad masks (precomputed, resident)
        # pw/pb/dwt/cb: folded params in SMEM (scalars read per channel)
        # o:   (oup, R, 128)  lane-dense output tile
        lane = lax.broadcasted_iota(jnp.int32, (R, 128), 1)
        sub = lax.broadcasted_iota(jnp.int32, (R, 128), 0)
        # positions whose vertical neighbour lies outside this row tile
        top_edge = (sub == 0) & (lane < W)
        bot_edge = (sub == R - 1) & (lane >= 128 - W)
        mask_l = ml_ref[...]
        mask_r = mr_ref[...]

        if has_halo:
            j = pl.program_id(1)
            top_keep = (j > 0).astype(f32)
            bot_keep = (j < nH - 1).astype(f32)

        for g in range(cinit):
            # ---- primary 1x1 conv + folded BN + ReLU (VPU broadcast-FMA) ----
            acc = xm_ref[0].astype(f32) * pw_ref[0 * cinit + g]
            for ci in range(1, cin):
                acc = acc + xm_ref[ci].astype(f32) * pw_ref[ci * cinit + g]
            x1 = jnp.maximum(acc + pb_ref[g], 0.0)
            # Write the primary channel immediately: keeps the live set small
            # and lets the writeback DMA overlap the depthwise compute below.
            o_ref[g] = x1.astype(out_dtype)

            ghosts = [r for r in range(ghosts_per_group)
                      if cinit + g * ghosts_per_group + r < oup]
            if not ghosts:
                continue  # ghost channels beyond oup are never computed

            # ---- x1 at the two halo rows (recomputed from the halo chunks) --
            if has_halo:
                acc_t = xt_ref[0, 7:8, :].astype(f32) * pw_ref[0 * cinit + g]
                acc_b = xb_ref[0, 0:1, :].astype(f32) * pw_ref[0 * cinit + g]
                for ci in range(1, cin):
                    acc_t = acc_t + xt_ref[ci, 7:8, :].astype(f32) * pw_ref[ci * cinit + g]
                    acc_b = acc_b + xb_ref[ci, 0:1, :].astype(f32) * pw_ref[ci * cinit + g]
                x1_top = jnp.maximum(acc_t + pb_ref[g], 0.0) * top_keep  # (1,128)
                x1_bot = jnp.maximum(acc_b + pb_ref[g], 0.0) * bot_keep  # (1,128)

            # ---- vertical neighbours via flat-index rolls (XLU, no copies) --
            # up[p] = x1[p - W] (row above), dn[p] = x1[p + W] (row below)
            c_up = _roll_lane(x1, W)
            up = jnp.where(lane < W, _roll_sub(c_up, 1), c_up)
            c_dn = _roll_lane(x1, 128 - W)
            dn = jnp.where(lane >= 128 - W, _roll_sub(c_dn, -1), c_dn)
            if has_halo:
                up = jnp.where(top_edge, _roll_lane(x1_top, W), up)
                dn = jnp.where(bot_edge, _roll_lane(x1_bot, 128 - W), dn)
            else:
                up = jnp.where(top_edge, 0.0, up)
                dn = jnp.where(bot_edge, 0.0, dn)

            for r in ghosts:
                m = g * ghosts_per_group + r  # ghost (x2) output channel index

                def tap(kh, kw, _m=m):
                    return dwt_ref[(kh * 3 + kw) * cnew + _m]

                # centre column contribution
                acc2 = tap(0, 1) * up + tap(1, 1) * x1 + tap(2, 1) * dn
                # left neighbour (w-1): flat shift down by one lane + edge mask
                g0 = tap(0, 0) * up + tap(1, 0) * x1 + tap(2, 0) * dn
                c0 = _roll_lane(g0, 1)
                s0 = jnp.where(lane < 1, _roll_sub(c0, 1), c0)
                acc2 = acc2 + s0 * mask_l
                # right neighbour (w+1): flat shift up by one lane + edge mask
                g2 = tap(0, 2) * up + tap(1, 2) * x1 + tap(2, 2) * dn
                c2 = _roll_lane(g2, 127)
                s2 = jnp.where(lane >= 127, _roll_sub(c2, -1), c2)
                acc2 = acc2 + s2 * mask_r

                x2 = jnp.maximum(acc2 + cb_ref[m], 0.0)
                o_ref[cinit + m] = x2.astype(out_dtype)

    return kernel


# -------------------------------- wrapper ------------------------------------


def _choose_row_tile(h, w, max_tile_elems):
    """Row-tile height th: divides H, keeps th*W a multiple of 1024 (so blocks
    are (8,128)-chunk aligned and halo chunks sit at fixed positions), prefers
    >= 2 row tiles, and bounds the per-step element count."""
    cands = [t for t in range(1, h) if h % t == 0 and (t * w) % 1024 == 0]
    good = [t for t in cands if t * w <= max_tile_elems]
    if good:
        return max(good)
    if cands:
        return min(cands)
    # TODO(synk): images with no chunk-aligned proper row tile fall back to one
    # tile per image (fine for small H*W; the batch axis still parallelises).
    return h


@functools.partial(jax.jit,
                   static_argnames=("oup", "ratio", "out_dtype",
                                    "max_tile_elems"))
def ghost_module_forward(x, pw, p_scale, p_bias, dw, c_scale, c_bias, *,
                         oup, ratio=2, out_dtype=jnp.float32,
                         max_tile_elems=2048):
    """GhostModule.forward (kernel_size=1, stride=1, dw_size=3, relu=True).

    NCHW in -> fused Pallas kernel on a lane-dense flat-spatial view -> NCHW
    out.  Eval-mode BatchNorm is folded into per-channel scale/bias.
    """
    n, cin, h, w = x.shape
    cinit = pw.shape[1]
    assert dw.shape[0] == 3 and dw.shape[1] == 3, "only dw_size=3 supported"
    cnew = dw.shape[2]
    ghosts_per_group = ratio - 1
    assert ghosts_per_group >= 1 and cnew == cinit * ghosts_per_group
    assert cinit <= oup <= cinit + cnew
    assert w <= 128, "TODO(synk): tile along W for very wide images"
    assert (h * w) % 128 == 0, "TODO(synk): pad H*W to a multiple of 128"
    assert cin * cinit <= 4096, "TODO(synk): MXU path for wide channel counts"

    hw = h * w
    hwc = hw // 128
    th = _choose_row_tile(h, w, max_tile_elems)
    nh = h // th
    r_chunks = (th * w) // 128
    has_halo = nh > 1

    f32 = jnp.float32
    # Fold the eval-mode BN scales into the conv weights (biases stay separate
    # and are added before the ReLU).
    pw_eff = (pw.astype(f32) * p_scale.astype(f32)[None, :]).reshape(-1)
    pb = p_bias.astype(f32).reshape(-1)
    dwt = (dw.astype(f32) * c_scale.astype(f32)[None, None, :]).reshape(-1)
    cb = c_bias.astype(f32).reshape(-1)

    # Lane-dense flat-spatial view of x: (N, C, H*W/128, 128) -- free reshape.
    x_flat = x.reshape(n, cin, hwc, 128)

    # Left/right zero-pad masks for the depthwise conv, in flat coordinates
    # (built here so the kernel never needs a vector integer modulo).
    wpos = (jnp.arange(r_chunks * 128, dtype=jnp.int32) % w).reshape(r_chunks, 128)
    mask_l = (wpos != 0).astype(f32)
    mask_r = (wpos != w - 1).astype(f32)

    kernel = _make_ghost_kernel(
        cin=cin, cinit=cinit, cnew=cnew, oup=oup,
        ghosts_per_group=ghosts_per_group, R=r_chunks, W=w, nH=nh,
        has_halo=has_halo, out_dtype=out_dtype)

    in_specs = [pl.BlockSpec((None, cin, r_chunks, 128),
                             lambda i, j: (i, 0, j, 0))]
    args = [x_flat]
    if has_halo:
        r8 = r_chunks // 8
        hwc8 = hwc // 8
        in_specs += [
            # (8,128)-aligned chunk blocks holding the halo rows: the row above
            # the tile is the last W lanes of chunk j*R-1 (block j*r8-1, slot 7)
            # and the row below is the first W lanes of chunk (j+1)*R (slot 0).
            pl.BlockSpec((None, cin, 8, 128),
                         lambda i, j: (i, 0, jnp.maximum(j * r8 - 1, 0), 0)),
            pl.BlockSpec((None, cin, 8, 128),
                         lambda i, j: (i, 0, jnp.minimum((j + 1) * r8, hwc8 - 1), 0)),
        ]
        args += [x_flat, x_flat]
    in_specs += [
        pl.BlockSpec((r_chunks, 128), lambda i, j: (0, 0)),   # mask_l (resident)
        pl.BlockSpec((r_chunks, 128), lambda i, j: (0, 0)),   # mask_r (resident)
        pl.BlockSpec(memory_space=pltpu.MemorySpace.SMEM),    # pw (scale-folded)
        pl.BlockSpec(memory_space=pltpu.MemorySpace.SMEM),    # primary bias
        pl.BlockSpec(memory_space=pltpu.MemorySpace.SMEM),    # dw taps (folded)
        pl.BlockSpec(memory_space=pltpu.MemorySpace.SMEM),    # cheap-op bias
    ]
    args += [mask_l, mask_r, pw_eff, pb, dwt, cb]

    out_specs = pl.BlockSpec((None, oup, r_chunks, 128),
                             lambda i, j: (i, 0, j, 0))
    out_shape = jax.ShapeDtypeStruct((n, oup, hwc, 128), out_dtype)

    # Scoped VMEM derived from real per-step bytes, capped for v7x (64 MiB/TC).
    x_bytes = x.dtype.itemsize
    o_bytes = jnp.dtype(out_dtype).itemsize
    step_bytes = 2 * (cin * r_chunks * 128 * x_bytes
                      + oup * r_chunks * 128 * o_bytes)
    if has_halo:
        step_bytes += 4 * cin * 8 * 128 * x_bytes
    step_bytes += 2 * r_chunks * 128 * 4
    vmem_limit = int(min(max(2 * step_bytes, 32 << 20), 48 << 20))

    kept_ghosts = oup - cinit
    m_elems = n * hw
    halo_elems = (n * nh * 2 * 128) if has_halo else 0
    cost = pl.CostEstimate(
        flops=int(2 * cin * cinit * (m_elems + halo_elems)
                  + 26 * kept_ghosts * m_elems
                  + 2 * (cinit + kept_ghosts) * m_elems),
        transcendentals=0,
        bytes_accessed=int(m_elems * cin * x_bytes
                           + (n * nh * 2 * cin * 8 * 128 * x_bytes if has_halo else 0)
                           + m_elems * oup * o_bytes
                           + 2 * r_chunks * 128 * 4
                           + 4 * (pw_eff.size + pb.size + dwt.size + cb.size)),
    )

    out_flat = pl.pallas_call(
        kernel,
        out_shape=out_shape,
        grid=(n, nh),
        in_specs=in_specs,
        out_specs=out_specs,
        compiler_params=pltpu.CompilerParams(
            dimension_semantics=("parallel", "parallel"),
            vmem_limit_bytes=vmem_limit),
        cost_estimate=cost,
    )(*args)

    return out_flat.reshape(n, oup, h, w)


# --------------------------- pure-JAX reference ------------------------------


def _reference(x, pw, p_scale, p_bias, dw, c_scale, c_bias, oup):
    xn = jnp.transpose(x, (0, 2, 3, 1))                        # NHWC, f32
    y = jnp.einsum("nhwc,cd->nhwd", xn, pw)
    x1 = jnp.maximum(y * p_scale + p_bias, 0.0)
    cinit = x1.shape[-1]
    cnew = dw.shape[2]
    x2 = lax.conv_general_dilated(
        x1, dw.reshape(3, 3, 1, cnew), window_strides=(1, 1), padding="SAME",
        dimension_numbers=("NHWC", "HWIO", "NHWC"),
        feature_group_count=cinit)
    x2 = jnp.maximum(x2 * c_scale + c_bias, 0.0)
    out = jnp.concatenate([x1, x2], axis=-1)[..., :oup]
    return jnp.transpose(out, (0, 3, 1, 2))


# ----------------------------------- main ------------------------------------


def _make_params(key, inp, oup, ratio):
    init_channels = math.ceil(oup / ratio)
    new_channels = init_channels * (ratio - 1)
    eps = 1e-5
    ks = jax.random.split(key, 10)
    pw = 0.5 * jax.random.normal(ks[0], (inp, init_channels), jnp.float32)
    p_gamma = 1.0 + 0.1 * jax.random.normal(ks[1], (init_channels,), jnp.float32)
    p_beta = 0.1 * jax.random.normal(ks[2], (init_channels,), jnp.float32)
    p_mean = 0.1 * jax.random.normal(ks[3], (init_channels,), jnp.float32)
    p_var = jnp.abs(jax.random.normal(ks[4], (init_channels,), jnp.float32)) + 0.5
    dw = 0.5 * jax.random.normal(ks[5], (3, 3, new_channels), jnp.float32)
    c_gamma = 1.0 + 0.1 * jax.random.normal(ks[6], (new_channels,), jnp.float32)
    c_beta = 0.1 * jax.random.normal(ks[7], (new_channels,), jnp.float32)
    c_mean = 0.1 * jax.random.normal(ks[8], (new_channels,), jnp.float32)
    c_var = jnp.abs(jax.random.normal(ks[9], (new_channels,), jnp.float32)) + 0.5
    p_scale = p_gamma / jnp.sqrt(p_var + eps)
    p_bias = p_beta - p_mean * p_scale
    c_scale = c_gamma / jnp.sqrt(c_var + eps)
    c_bias = c_beta - c_mean * c_scale
    return pw, p_scale, p_bias, dw, c_scale, c_bias


if __name__ == "__main__":
    key = jax.random.PRNGKey(0)
    k1, k2, k3, k4 = jax.random.split(key, 4)

    # Case 1: default GhostModule hyper-params at small NCHW shapes.
    x_a = jax.random.normal(k1, (2, 4, 16, 16), jnp.float32)
    params_a = _make_params(k2, inp=4, oup=8, ratio=2)
    out_a = jax.block_until_ready(ghost_module_forward(x_a, *params_a, oup=8))
    ref_a = _reference(x_a, *params_a, oup=8)
    assert out_a.shape == (2, 8, 16, 16), out_a.shape
    assert jnp.allclose(out_a, ref_a, rtol=1e-4, atol=1e-4), float(
        jnp.max(jnp.abs(out_a - ref_a)))

    # Case 2: taller image (exercises the cross-row-tile halo path with N=1,
    # two parallel grid steps) and an odd oup (drops the last ghost channel).
    x_b = jax.random.normal(k3, (1, 4, 128, 16), jnp.float32)
    params_b = _make_params(k4, inp=4, oup=7, ratio=2)
    out_b = jax.block_until_ready(ghost_module_forward(x_b, *params_b, oup=7))
    ref_b = _reference(x_b, *params_b, oup=7)
    assert out_b.shape == (1, 7, 128, 16), out_b.shape
    assert jnp.allclose(out_b, ref_b, rtol=1e-4, atol=1e-4), float(
        jnp.max(jnp.abs(out_b - ref_b)))

    print("KERNEL_OK")
</pallas_src>

<mosaic_0001>
module attributes {stable_mosaic.version = 11 : i64} {
  func.func @kernel(%arg0: i32, %arg1: i32, %arg2: memref<1x4x2x128xf32, #tpu.memory_space<vmem>>, %arg3: memref<2x128xf32, #tpu.memory_space<vmem>>, %arg4: memref<2x128xf32, #tpu.memory_space<vmem>>, %arg5: memref<16xf32, #tpu.memory_space<smem>>, %arg6: memref<4xf32, #tpu.memory_space<smem>>, %arg7: memref<36xf32, #tpu.memory_space<smem>>, %arg8: memref<4xf32, #tpu.memory_space<smem>>, %arg9: memref<1x8x2x128xf32, #tpu.memory_space<vmem>>) attributes {dimension_semantics = [#tpu.dimension_semantics<parallel>, #tpu.dimension_semantics<parallel>], iteration_bounds = array<i64: 2, 1>, scalar_prefetch = 0 : i64, scratch_operands = 0 : i64, tpu.core_type = #tpu.core_type<tc>, window_params = [{transform_indices = @transform_0, window_bounds = array<i64: 1, 4, 2, 128>}, {pipeline_mode = #tpu.pipeline_mode<synchronous>, transform_indices = @transform_1, window_bounds = array<i64: 2, 128>}, {pipeline_mode = #tpu.pipeline_mode<synchronous>, transform_indices = @transform_2, window_bounds = array<i64: 2, 128>}, {transform_indices = @transform_3, window_bounds = array<i64: 16>}, {transform_indices = @transform_4, window_bounds = array<i64: 4>}, {transform_indices = @transform_5, window_bounds = array<i64: 36>}, {transform_indices = @transform_6, window_bounds = array<i64: 4>}, {transform_indices = @transform_7, window_bounds = array<i64: 1, 8, 2, 128>}]} {
    %0 = tpu.iota {dimensions = array<i32: 1>} : vector<2x128xi32>
    %1 = tpu.iota {dimensions = array<i32: 0>} : vector<2x128xi32>
    %c0_i32 = arith.constant 0 : i32
    %2 = vector.broadcast %c0_i32 : i32 to vector<2x128xi32>
    %3 = arith.cmpi eq, %1, %2 : vector<2x128xi32>
    %c16_i32 = arith.constant 16 : i32
    %4 = vector.broadcast %c16_i32 : i32 to vector<2x128xi32>
    %5 = arith.cmpi slt, %0, %4 : vector<2x128xi32>
    %6 = arith.andi %3, %5 : vector<2x128xi1>
    %c1_i32 = arith.constant 1 : i32
    %7 = vector.broadcast %c1_i32 : i32 to vector<2x128xi32>
    %8 = arith.cmpi eq, %1, %7 : vector<2x128xi32>
    %c112_i32 = arith.constant 112 : i32
    %9 = vector.broadcast %c112_i32 : i32 to vector<2x128xi32>
    %10 = arith.cmpi sge, %0, %9 : vector<2x128xi32>
    %11 = arith.andi %8, %10 : vector<2x128xi1>
    %c0 = arith.constant 0 : index
    %c0_0 = arith.constant 0 : index
    %12 = vector.load %arg3[%c0, %c0_0] : memref<2x128xf32, #tpu.memory_space<vmem>>, vector<2x128xf32>
    %c0_1 = arith.constant 0 : index
    %c0_2 = arith.constant 0 : index
    %13 = vector.load %arg4[%c0_1, %c0_2] : memref<2x128xf32, #tpu.memory_space<vmem>>, vector<2x128xf32>
    %c0_3 = arith.constant 0 : index
    %c0_4 = arith.constant 0 : index
    %c0_5 = arith.constant 0 : index
    %c0_6 = arith.constant 0 : index
    %14 = vector.load %arg2[%c0_3, %c0_4, %c0_5, %c0_6] : memref<1x4x2x128xf32, #tpu.memory_space<vmem>>, vector<1x1x2x128xf32>
    %15 = vector.shape_cast %14 : vector<1x1x2x128xf32> to vector<2x128xf32>
    %c0_7 = arith.constant 0 : index
    %16 = memref.load %arg5[%c0_7] : memref<16xf32, #tpu.memory_space<smem>>
    %17 = vector.broadcast %16 : f32 to vector<2x128xf32>
    %18 = arith.mulf %15, %17 : vector<2x128xf32>
    %c0_8 = arith.constant 0 : index
    %c1 = arith.constant 1 : index
    %c0_9 = arith.constant 0 : index
    %c0_10 = arith.constant 0 : index
    %19 = vector.load %arg2[%c0_8, %c1, %c0_9, %c0_10] : memref<1x4x2x128xf32, #tpu.memory_space<vmem>>, vector<1x1x2x128xf32>
    %20 = vector.shape_cast %19 : vector<1x1x2x128xf32> to vector<2x128xf32>
    %c4 = arith.constant 4 : index
    %21 = memref.load %arg5[%c4] : memref<16xf32, #tpu.memory_space<smem>>
    %22 = vector.broadcast %21 : f32 to vector<2x128xf32>
    %23 = arith.mulf %20, %22 : vector<2x128xf32>
    %24 = arith.addf %18, %23 : vector<2x128xf32>
    %c0_11 = arith.constant 0 : index
    %c2 = arith.constant 2 : index
    %c0_12 = arith.constant 0 : index
    %c0_13 = arith.constant 0 : index
    %25 = vector.load %arg2[%c0_11, %c2, %c0_12, %c0_13] : memref<1x4x2x128xf32, #tpu.memory_space<vmem>>, vector<1x1x2x128xf32>
    %26 = vector.shape_cast %25 : vector<1x1x2x128xf32> to vector<2x128xf32>
    %c8 = arith.constant 8 : index
    %27 = memref.load %arg5[%c8] : memref<16xf32, #tpu.memory_space<smem>>
    %28 = vector.broadcast %27 : f32 to vector<2x128xf32>
    %29 = arith.mulf %26, %28 : vector<2x128xf32>
    %30 = arith.addf %24, %29 : vector<2x128xf32>
    %c0_14 = arith.constant 0 : index
    %c3 = arith.constant 3 : index
    %c0_15 = arith.constant 0 : index
    %c0_16 = arith.constant 0 : index
    %31 = vector.load %arg2[%c0_14, %c3, %c0_15, %c0_16] : memref<1x4x2x128xf32, #tpu.memory_space<vmem>>, vector<1x1x2x128xf32>
    %32 = vector.shape_cast %31 : vector<1x1x2x128xf32> to vector<2x128xf32>
    %c12 = arith.constant 12 : index
    %33 = memref.load %arg5[%c12] : memref<16xf32, #tpu.memory_space<smem>>
    %34 = vector.broadcast %33 : f32 to vector<2x128xf32>
    %35 = arith.mulf %32, %34 : vector<2x128xf32>
    %36 = arith.addf %30, %35 : vector<2x128xf32>
    %c0_17 = arith.constant 0 : index
    %37 = memref.load %arg6[%c0_17] : memref<4xf32, #tpu.memory_space<smem>>
    %38 = vector.broadcast %37 : f32 to vector<2x128xf32>
    %39 = arith.addf %36, %38 : vector<2x128xf32>
    %cst = arith.constant 0.000000e+00 : f32
    %40 = vector.broadcast %cst : f32 to vector<2x128xf32>
    %41 = arith.maximumf %39, %40 : vector<2x128xf32>
    %c0_18 = arith.constant 0 : index
    %c0_19 = arith.constant 0 : index
    %c0_20 = arith.constant 0 : index
    %c0_21 = arith.constant 0 : index
    %42 = vector.load %arg9[%c0_18, %c0_19, %c0_20, %c0_21] : memref<1x8x2x128xf32, #tpu.memory_space<vmem>>, vector<1x1x2x128xf32>
    %43 = vector.shape_cast %42 : vector<1x1x2x128xf32> to vector<2x128xf32>
    %44 = vector.shape_cast %41 : vector<2x128xf32> to vector<1x1x2x128xf32>
    tpu.vector_store %arg9[%c0_18, %c0_19, %c0_20, %c0_21], %44 {strides = array<i32>} : memref<1x8x2x128xf32, #tpu.memory_space<vmem>>, vector<1x1x2x128xf32>,
    %c16_i32_22 = arith.constant 16 : i32
    %45 = tpu.dynamic_rotate %41 by %c16_i32_22 dim 1 : vector<2x128xf32>, i32 -> vector<2x128xf32>
    %c16_i32_23 = arith.constant 16 : i32
    %46 = vector.broadcast %c16_i32_23 : i32 to vector<2x128xi32>
    %47 = arith.cmpi slt, %0, %46 : vector<2x128xi32>
    %c1_i32_24 = arith.constant 1 : i32
    %48 = tpu.dynamic_rotate %45 by %c1_i32_24 dim 0 : vector<2x128xf32>, i32 -> vector<2x128xf32>
    %49 = arith.select %47, %48, %45 : vector<2x128xi1>, vector<2x128xf32>
    %c112_i32_25 = arith.constant 112 : i32
    %50 = tpu.dynamic_rotate %41 by %c112_i32_25 dim 1 : vector<2x128xf32>, i32 -> vector<2x128xf32>
    %c112_i32_26 = arith.constant 112 : i32
    %51 = vector.broadcast %c112_i32_26 : i32 to vector<2x128xi32>
    %52 = arith.cmpi sge, %0, %51 : vector<2x128xi32>
    %c1_i32_27 = arith.constant 1 : i32
    %53 = tpu.dynamic_rotate %50 by %c1_i32_27 dim 0 : vector<2x128xf32>, i32 -> vector<2x128xf32>
    %54 = arith.select %52, %53, %50 : vector<2x128xi1>, vector<2x128xf32>
    %cst_28 = arith.constant 0.000000e+00 : f32
    %55 = vector.broadcast %cst_28 : f32 to vector<2x128xf32>
    %56 = arith.select %6, %55, %49 : vector<2x128xi1>, vector<2x128xf32>
    %cst_29 = arith.constant 0.000000e+00 : f32
    %57 = vector.broadcast %cst_29 : f32 to vector<2x128xf32>
    %58 = arith.select %11, %57, %54 : vector<2x128xi1>, vector<2x128xf32>
    %c4_30 = arith.constant 4 : index
    %59 = memref.load %arg7[%c4_30] : memref<36xf32, #tpu.memory_space<smem>>
    %60 = vector.broadcast %59 : f32 to vector<2x128xf32>
    %61 = arith.mulf %60, %56 : vector<2x128xf32>
    %c16 = arith.constant 16 : index
    %62 = memref.load %arg7[%c16] : memref<36xf32, #tpu.memory_space<smem>>
    %63 = vector.broadcast %62 : f32 to vector<2x128xf32>
    %64 = arith.mulf %63, %41 : vector<2x128xf32>
    %65 = arith.addf %61, %64 : vector<2x128xf32>
    %c28 = arith.constant 28 : index
    %66 = memref.load %arg7[%c28] : memref<36xf32, #tpu.memory_space<smem>>
    %67 = vector.broadcast %66 : f32 to vector<2x128xf32>
    %68 = arith.mulf %67, %58 : vector<2x128xf32>
    %69 = arith.addf %65, %68 : vector<2x128xf32>
    %c0_31 = arith.constant 0 : index
    %70 = memref.load %arg7[%c0_31] : memref<36xf32, #tpu.memory_space<smem>>
    %71 = vector.broadcast %70 : f32 to vector<2x128xf32>
    %72 = arith.mulf %71, %56 : vector<2x128xf32>
    %c12_32 = arith.constant 12 : index
    %73 = memref.load %arg7[%c12_32] : memref<36xf32, #tpu.memory_space<smem>>
    %74 = vector.broadcast %73 : f32 to vector<2x128xf32>
    %75 = arith.mulf %74, %41 : vector<2x128xf32>
    %76 = arith.addf %72, %75 : vector<2x128xf32>
    %c24 = arith.constant 24 : index
    %77 = memref.load %arg7[%c24] : memref<36xf32, #tpu.memory_space<smem>>
    %78 = vector.broadcast %77 : f32 to vector<2x128xf32>
    %79 = arith.mulf %78, %58 : vector<2x128xf32>
    %80 = arith.addf %76, %79 : vector<2x128xf32>
    %c1_i32_33 = arith.constant 1 : i32
    %81 = tpu.dynamic_rotate %80 by %c1_i32_33 dim 1 : vector<2x128xf32>, i32 -> vector<2x128xf32>
    %c1_i32_34 = arith.constant 1 : i32
    %82 = vector.broadcast %c1_i32_34 : i32 to vector<2x128xi32>
    %83 = arith.cmpi slt, %0, %82 : vector<2x128xi32>
    %c1_i32_35 = arith.constant 1 : i32
    %84 = tpu.dynamic_rotate %81 by %c1_i32_35 dim 0 : vector<2x128xf32>, i32 -> vector<2x128xf32>
    %85 = arith.select %83, %84, %81 : vector<2x128xi1>, vector<2x128xf32>
    %86 = arith.mulf %85, %12 : vector<2x128xf32>
    %87 = arith.addf %69, %86 : vector<2x128xf32>
    %c8_36 = arith.constant 8 : index
    %88 = memref.load %arg7[%c8_36] : memref<36xf32, #tpu.memory_space<smem>>
    %89 = vector.broadcast %88 : f32 to vector<2x128xf32>
    %90 = arith.mulf %89, %56 : vector<2x128xf32>
    %c20 = arith.constant 20 : index
    %91 = memref.load %arg7[%c20] : memref<36xf32, #tpu.memory_space<smem>>
    %92 = vector.broadcast %91 : f32 to vector<2x128xf32>
    %93 = arith.mulf %92, %41 : vector<2x128xf32>
    %94 = arith.addf %90, %93 : vector<2x128xf32>
    %c32 = arith.constant 32 : index
    %95 = memref.load %arg7[%c32] : memref<36xf32, #tpu.memory_space<smem>>
    %96 = vector.broadcast %95 : f32 to vector<2x128xf32>
    %97 = arith.mulf %96, %58 : vector<2x128xf32>
    %98 = arith.addf %94, %97 : vector<2x128xf32>
    %c127_i32 = arith.constant 127 : i32
    %99 = tpu.dynamic_rotate %98 by %c127_i32 dim 1 : vector<2x128xf32>, i32 -> vector<2x128xf32>
    %c127_i32_37 = arith.constant 127 : i32
    %100 = vector.broadcast %c127_i32_37 : i32 to vector<2x128xi32>
    %101 = arith.cmpi sge, %0, %100 : vector<2x128xi32>
    %c1_i32_38 = arith.constant 1 : i32
    %102 = tpu.dynamic_rotate %99 by %c1_i32_38 dim 0 : vector<2x128xf32>, i32 -> vector<2x128xf32>
    %103 = arith.select %101, %102, %99 : vector<2x128xi1>, vector<2x128xf32>
    %104 = arith.mulf %103, %13 : vector<2x128xf32>
    %105 = arith.addf %87, %104 : vector<2x128xf32>
    %c0_39 = arith.constant 0 : index
    %106 = memref.load %arg8[%c0_39] : memref<4xf32, #tpu.memory_space<smem>>
    %107 = vector.broadcast %106 : f32 to vector<2x128xf32>
    %108 = arith.addf %105, %107 : vector<2x128xf32>
    %cst_40 = arith.constant 0.000000e+00 : f32
    %109 = vector.broadcast %cst_40 : f32 to vector<2x128xf32>
    %110 = arith.maximumf %108, %109 : vector<2x128xf32>
    %c0_41 = arith.constant 0 : index
    %c4_42 = arith.constant 4 : index
    %c0_43 = arith.constant 0 : index
    %c0_44 = arith.constant 0 : index
    %111 = vector.load %arg9[%c0_41, %c4_42, %c0_43, %c0_44] : memref<1x8x2x128xf32, #tpu.memory_space<vmem>>, vector<1x1x2x128xf32>
    %112 = vector.shape_cast %111 : vector<1x1x2x128xf32> to vector<2x128xf32>
    %113 = vector.shape_cast %110 : vector<2x128xf32> to vector<1x1x2x128xf32>
    tpu.vector_store %arg9[%c0_41, %c4_42, %c0_43, %c0_44], %113 {strides = array<i32>} : memref<1x8x2x128xf32, #tpu.memory_space<vmem>>, vector<1x1x2x128xf32>,
    %c0_45 = arith.constant 0 : index
    %c0_46 = arith.constant 0 : index
    %c0_47 = arith.constant 0 : index
    %c0_48 = arith.constant 0 : index
    %114 = vector.load %arg2[%c0_45, %c0_46, %c0_47, %c0_48] : memref<1x4x2x128xf32, #tpu.memory_space<vmem>>, vector<1x1x2x128xf32>
    %115 = vector.shape_cast %114 : vector<1x1x2x128xf32> to vector<2x128xf32>
    %c1_49 = arith.constant 1 : index
    %116 = memref.load %arg5[%c1_49] : memref<16xf32, #tpu.memory_space<smem>>
    %117 = vector.broadcast %116 : f32 to vector<2x128xf32>
    %118 = arith.mulf %115, %117 : vector<2x128xf32>
    %c0_50 = arith.constant 0 : index
    %c1_51 = arith.constant 1 : index
    %c0_52 = arith.constant 0 : index
    %c0_53 = arith.constant 0 : index
    %119 = vector.load %arg2[%c0_50, %c1_51, %c0_52, %c0_53] : memref<1x4x2x128xf32, #tpu.memory_space<vmem>>, vector<1x1x2x128xf32>
    %120 = vector.shape_cast %119 : vector<1x1x2x128xf32> to vector<2x128xf32>
    %c5 = arith.constant 5 : index
    %121 = memref.load %arg5[%c5] : memref<16xf32, #tpu.memory_space<smem>>
    %122 = vector.broadcast %121 : f32 to vector<2x128xf32>
    %123 = arith.mulf %120, %122 : vector<2x128xf32>
    %124 = arith.addf %118, %123 : vector<2x128xf32>
    %c0_54 = arith.constant 0 : index
    %c2_55 = arith.constant 2 : index
    %c0_56 = arith.constant 0 : index
    %c0_57 = arith.constant 0 : index
    %125 = vector.load %arg2[%c0_54, %c2_55, %c0_56, %c0_57] : memref<1x4x2x128xf32, #tpu.memory_space<vmem>>, vector<1x1x2x128xf32>
    %126 = vector.shape_cast %125 : vector<1x1x2x128xf32> to vector<2x128xf32>
    %c9 = arith.constant 9 : index
    %127 = memref.load %arg5[%c9] : memref<16xf32, #tpu.memory_space<smem>>
    %128 = vector.broadcast %127 : f32 to vector<2x128xf32>
    %129 = arith.mulf %126, %128 : vector<2x128xf32>
    %130 = arith.addf %124, %129 : vector<2x128xf32>
    %c0_58 = arith.constant 0 : index
    %c3_59 = arith.constant 3 : index
    %c0_60 = arith.constant 0 : index
    %c0_61 = arith.constant 0 : index
    %131 = vector.load %arg2[%c0_58, %c3_59, %c0_60, %c0_61] : memref<1x4x2x128xf32, #tpu.memory_space<vmem>>, vector<1x1x2x128xf32>
    %132 = vector.shape_cast %131 : vector<1x1x2x128xf32> to vector<2x128xf32>
    %c13 = arith.constant 13 : index
    %133 = memref.load %arg5[%c13] : memref<16xf32, #tpu.memory_space<smem>>
    %134 = vector.broadcast %133 : f32 to vector<2x128xf32>
    %135 = arith.mulf %132, %134 : vector<2x128xf32>
    %136 = arith.addf %130, %135 : vector<2x128xf32>
    %c1_62 = arith.constant 1 : index
    %137 = memref.load %arg6[%c1_62] : memref<4xf32, #tpu.memory_space<smem>>
    %138 = vector.broadcast %137 : f32 to vector<2x128xf32>
    %139 = arith.addf %136, %138 : vector<2x128xf32>
    %cst_63 = arith.constant 0.000000e+00 : f32
    %140 = vector.broadcast %cst_63 : f32 to vector<2x128xf32>
    %141 = arith.maximumf %139, %140 : vector<2x128xf32>
    %c0_64 = arith.constant 0 : index
    %c1_65 = arith.constant 1 : index
    %c0_66 = arith.constant 0 : index
    %c0_67 = arith.constant 0 : index
    %142 = vector.load %arg9[%c0_64, %c1_65, %c0_66, %c0_67] : memref<1x8x2x128xf32, #tpu.memory_space<vmem>>, vector<1x1x2x128xf32>
    %143 = vector.shape_cast %142 : vector<1x1x2x128xf32> to vector<2x128xf32>
    %144 = vector.shape_cast %141 : vector<2x128xf32> to vector<1x1x2x128xf32>
    tpu.vector_store %arg9[%c0_64, %c1_65, %c0_66, %c0_67], %144 {strides = array<i32>} : memref<1x8x2x128xf32, #tpu.memory_space<vmem>>, vector<1x1x2x128xf32>,
    %c16_i32_68 = arith.constant 16 : i32
    %145 = tpu.dynamic_rotate %141 by %c16_i32_68 dim 1 : vector<2x128xf32>, i32 -> vector<2x128xf32>
    %c16_i32_69 = arith.constant 16 : i32
    %146 = vector.broadcast %c16_i32_69 : i32 to vector<2x128xi32>
    %147 = arith.cmpi slt, %0, %146 : vector<2x128xi32>
    %c1_i32_70 = arith.constant 1 : i32
    %148 = tpu.dynamic_rotate %145 by %c1_i32_70 dim 0 : vector<2x128xf32>, i32 -> vector<2x128xf32>
    %149 = arith.select %147, %148, %145 : vector<2x128xi1>, vector<2x128xf32>
    %c112_i32_71 = arith.constant 112 : i32
    %150 = tpu.dynamic_rotate %141 by %c112_i32_71 dim 1 : vector<2x128xf32>, i32 -> vector<2x128xf32>
    %c112_i32_72 = arith.constant 112 : i32
    %151 = vector.broadcast %c112_i32_72 : i32 to vector<2x128xi32>
    %152 = arith.cmpi sge, %0, %151 : vector<2x128xi32>
    %c1_i32_73 = arith.constant 1 : i32
    %153 = tpu.dynamic_rotate %150 by %c1_i32_73 dim 0 : vector<2x128xf32>, i32 -> vector<2x128xf32>
    %154 = arith.select %152, %153, %150 : vector<2x128xi1>, vector<2x128xf32>
    %cst_74 = arith.constant 0.000000e+00 : f32
    %155 = vector.broadcast %cst_74 : f32 to vector<2x128xf32>
    %156 = arith.select %6, %155, %149 : vector<2x128xi1>, vector<2x128xf32>
    %cst_75 = arith.constant 0.000000e+00 : f32
    %157 = vector.broadcast %cst_75 : f32 to vector<2x128xf32>
    %158 = arith.select %11, %157, %154 : vector<2x128xi1>, vector<2x128xf32>
    %c5_76 = arith.constant 5 : index
    %159 = memref.load %arg7[%c5_76] : memref<36xf32, #tpu.memory_space<smem>>
    %160 = vector.broadcast %159 : f32 to vector<2x128xf32>
    %161 = arith.mulf %160, %156 : vector<2x128xf32>
    %c17 = arith.constant 17 : index
    %162 = memref.load %arg7[%c17] : memref<36xf32, #tpu.memory_space<smem>>
    %163 = vector.broadcast %162 : f32 to vector<2x128xf32>
    %164 = arith.mulf %163, %141 : vector<2x128xf32>
    %165 = arith.addf %161, %164 : vector<2x128xf32>
    %c29 = arith.constant 29 : index
    %166 = memref.load %arg7[%c29] : memref<36xf32, #tpu.memory_space<smem>>
    %167 = vector.broadcast %166 : f32 to vector<2x128xf32>
    %168 = arith.mulf %167, %158 : vector<2x128xf32>
    %169 = arith.addf %165, %168 : vector<2x128xf32>
    %c1_77 = arith.constant 1 : index
    %170 = memref.load %arg7[%c1_77] : memref<36xf32, #tpu.memory_space<smem>>
    %171 = vector.broadcast %170 : f32 to vector<2x128xf32>
    %172 = arith.mulf %171, %156 : vector<2x128xf32>
    %c13_78 = arith.constant 13 : index
    %173 = memref.load %arg7[%c13_78] : memref<36xf32, #tpu.memory_space<smem>>
    %174 = vector.broadcast %173 : f32 to vector<2x128xf32>
    %175 = arith.mulf %174, %141 : vector<2x128xf32>
    %176 = arith.addf %172, %175 : vector<2x128xf32>
    %c25 = arith.constant 25 : index
    %177 = memref.load %arg7[%c25] : memref<36xf32, #tpu.memory_space<smem>>
    %178 = vector.broadcast %177 : f32 to vector<2x128xf32>
    %179 = arith.mulf %178, %158 : vector<2x128xf32>
    %180 = arith.addf %176, %179 : vector<2x128xf32>
    %c1_i32_79 = arith.constant 1 : i32
    %181 = tpu.dynamic_rotate %180 by %c1_i32_79 dim 1 : vector<2x128xf32>, i32 -> vector<2x128xf32>
    %c1_i32_80 = arith.constant 1 : i32
    %182 = vector.broadcast %c1_i32_80 : i32 to vector<2x128xi32>
    %183 = arith.cmpi slt, %0, %182 : vector<2x128xi32>
    %c1_i32_81 = arith.constant 1 : i32
    %184 = tpu.dynamic_rotate %181 by %c1_i32_81 dim 0 : vector<2x128xf32>, i32 -> vector<2x128xf32>
    %185 = arith.select %183, %184, %181 : vector<2x128xi1>, vector<2x128xf32>
    %186 = arith.mulf %185, %12 : vector<2x128xf32>
    %187 = arith.addf %169, %186 : vector<2x128xf32>
    %c9_82 = arith.constant 9 : index
    %188 = memref.load %arg7[%c9_82] : memref<36xf32, #tpu.memory_space<smem>>
    %189 = vector.broadcast %188 : f32 to vector<2x128xf32>
    %190 = arith.mulf %189, %156 : vector<2x128xf32>
    %c21 = arith.constant 21 : index
    %191 = memref.load %arg7[%c21] : memref<36xf32, #tpu.memory_space<smem>>
    %192 = vector.broadcast %191 : f32 to vector<2x128xf32>
    %193 = arith.mulf %192, %141 : vector<2x128xf32>
    %194 = arith.addf %190, %193 : vector<2x128xf32>
    %c33 = arith.constant 33 : index
    %195 = memref.load %arg7[%c33] : memref<36xf32, #tpu.memory_space<smem>>
    %196 = vector.broadcast %195 : f32 to vector<2x128xf32>
    %197 = arith.mulf %196, %158 : vector<2x128xf32>
    %198 = arith.addf %194, %197 : vector<2x128xf32>
    %c127_i32_83 = arith.constant 127 : i32
    %199 = tpu.dynamic_rotate %198 by %c127_i32_83 dim 1 : vector<2x128xf32>, i32 -> vector<2x128xf32>
    %c127_i32_84 = arith.constant 127 : i32
    %200 = vector.broadcast %c127_i32_84 : i32 to vector<2x128xi32>
    %201 = arith.cmpi sge, %0, %200 : vector<2x128xi32>
    %c1_i32_85 = arith.constant 1 : i32
    %202 = tpu.dynamic_rotate %199 by %c1_i32_85 dim 0 : vector<2x128xf32>, i32 -> vector<2x128xf32>
    %203 = arith.select %201, %202, %199 : vector<2x128xi1>, vector<2x128xf32>
    %204 = arith.mulf %203, %13 : vector<2x128xf32>
    %205 = arith.addf %187, %204 : vector<2x128xf32>
    %c1_86 = arith.constant 1 : index
    %206 = memref.load %arg8[%c1_86] : memref<4xf32, #tpu.memory_space<smem>>
    %207 = vector.broadcast %206 : f32 to vector<2x128xf32>
    %208 = arith.addf %205, %207 : vector<2x128xf32>
    %cst_87 = arith.constant 0.000000e+00 : f32
    %209 = vector.broadcast %cst_87 : f32 to vector<2x128xf32>
    %210 = arith.maximumf %208, %209 : vector<2x128xf32>
    %c0_88 = arith.constant 0 : index
    %c5_89 = arith.constant 5 : index
    %c0_90 = arith.constant 0 : index
    %c0_91 = arith.constant 0 : index
    %211 = vector.load %arg9[%c0_88, %c5_89, %c0_90, %c0_91] : memref<1x8x2x128xf32, #tpu.memory_space<vmem>>, vector<1x1x2x128xf32>
    %212 = vector.shape_cast %211 : vector<1x1x2x128xf32> to vector<2x128xf32>
    %213 = vector.shape_cast %210 : vector<2x128xf32> to vector<1x1x2x128xf32>
    tpu.vector_store %arg9[%c0_88, %c5_89, %c0_90, %c0_91], %213 {strides = array<i32>} : memref<1x8x2x128xf32, #tpu.memory_space<vmem>>, vector<1x1x2x128xf32>,
    %c0_92 = arith.constant 0 : index
    %c0_93 = arith.constant 0 : index
    %c0_94 = arith.constant 0 : index
    %c0_95 = arith.constant 0 : index
    %214 = vector.load %arg2[%c0_92, %c0_93, %c0_94, %c0_95] : memref<1x4x2x128xf32, #tpu.memory_space<vmem>>, vector<1x1x2x128xf32>
    %215 = vector.shape_cast %214 : vector<1x1x2x128xf32> to vector<2x128xf32>
    %c2_96 = arith.constant 2 : index
    %216 = memref.load %arg5[%c2_96] : memref<16xf32, #tpu.memory_space<smem>>
    %217 = vector.broadcast %216 : f32 to vector<2x128xf32>
    %218 = arith.mulf %215, %217 : vector<2x128xf32>
    %c0_97 = arith.constant 0 : index
    %c1_98 = arith.constant 1 : index
    %c0_99 = arith.constant 0 : index
    %c0_100 = arith.constant 0 : index
    %219 = vector.load %arg2[%c0_97, %c1_98, %c0_99, %c0_100] : memref<1x4x2x128xf32, #tpu.memory_space<vmem>>, vector<1x1x2x128xf32>
    %220 = vector.shape_cast %219 : vector<1x1x2x128xf32> to vector<2x128xf32>
    %c6 = arith.constant 6 : index
    %221 = memref.load %arg5[%c6] : memref<16xf32, #tpu.memory_space<smem>>
    %222 = vector.broadcast %221 : f32 to vector<2x128xf32>
    %223 = arith.mulf %220, %222 : vector<2x128xf32>
    %224 = arith.addf %218, %223 : vector<2x128xf32>
    %c0_101 = arith.constant 0 : index
    %c2_102 = arith.constant 2 : index
    %c0_103 = arith.constant 0 : index
    %c0_104 = arith.constant 0 : index
    %225 = vector.load %arg2[%c0_101, %c2_102, %c0_103, %c0_104] : memref<1x4x2x128xf32, #tpu.memory_space<vmem>>, vector<1x1x2x128xf32>
    %226 = vector.shape_cast %225 : vector<1x1x2x128xf32> to vector<2x128xf32>
    %c10 = arith.constant 10 : index
    %227 = memref.load %arg5[%c10] : memref<16xf32, #tpu.memory_space<smem>>
    %228 = vector.broadcast %227 : f32 to vector<2x128xf32>
    %229 = arith.mulf %226, %228 : vector<2x128xf32>
    %230 = arith.addf %224, %229 : vector<2x128xf32>
    %c0_105 = arith.constant 0 : index
    %c3_106 = arith.constant 3 : index
    %c0_107 = arith.constant 0 : index
    %c0_108 = arith.constant 0 : index
    %231 = vector.load %arg2[%c0_105, %c3_106, %c0_107, %c0_108] : memref<1x4x2x128xf32, #tpu.memory_space<vmem>>, vector<1x1x2x128xf32>
    %232 = vector.shape_cast %231 : vector<1x1x2x128xf32> to vector<2x128xf32>
    %c14 = arith.constant 14 : index
    %233 = memref.load %arg5[%c14] : memref<16xf32, #tpu.memory_space<smem>>
    %234 = vector.broadcast %233 : f32 to vector<2x128xf32>
    %235 = arith.mulf %232, %234 : vector<2x128xf32>
    %236 = arith.addf %230, %235 : vector<2x128xf32>
    %c2_109 = arith.constant 2 : index
    %237 = memref.load %arg6[%c2_109] : memref<4xf32, #tpu.memory_space<smem>>
    %238 = vector.broadcast %237 : f32 to vector<2x128xf32>
    %239 = arith.addf %236, %238 : vector<2x128xf32>
    %cst_110 = arith.constant 0.000000e+00 : f32
    %240 = vector.broadcast %cst_110 : f32 to vector<2x128xf32>
    %241 = arith.maximumf %239, %240 : vector<2x128xf32>
    %c0_111 = arith.constant 0 : index
    %c2_112 = arith.constant 2 : index
    %c0_113 = arith.constant 0 : index
    %c0_114 = arith.constant 0 : index
    %242 = vector.load %arg9[%c0_111, %c2_112, %c0_113, %c0_114] : memref<1x8x2x128xf32, #tpu.memory_space<vmem>>, vector<1x1x2x128xf32>
    %243 = vector.shape_cast %242 : vector<1x1x2x128xf32> to vector<2x128xf32>
    %244 = vector.shape_cast %241 : vector<2x128xf32> to vector<1x1x2x128xf32>
    tpu.vector_store %arg9[%c0_111, %c2_112, %c0_113, %c0_114], %244 {strides = array<i32>} : memref<1x8x2x128xf32, #tpu.memory_space<vmem>>, vector<1x1x2x128xf32>,
    %c16_i32_115 = arith.constant 16 : i32
    %245 = tpu.dynamic_rotate %241 by %c16_i32_115 dim 1 : vector<2x128xf32>, i32 -> vector<2x128xf32>
    %c16_i32_116 = arith.constant 16 : i32
    %246 = vector.broadcast %c16_i32_116 : i32 to vector<2x128xi32>
    %247 = arith.cmpi slt, %0, %246 : vector<2x128xi32>
    %c1_i32_117 = arith.constant 1 : i32
    %248 = tpu.dynamic_rotate %245 by %c1_i32_117 dim 0 : vector<2x128xf32>, i32 -> vector<2x128xf32>
    %249 = arith.select %247, %248, %245 : vector<2x128xi1>, vector<2x128xf32>
    %c112_i32_118 = arith.constant 112 : i32
    %250 = tpu.dynamic_rotate %241 by %c112_i32_118 dim 1 : vector<2x128xf32>, i32 -> vector<2x128xf32>
    %c112_i32_119 = arith.constant 112 : i32
    %251 = vector.broadcast %c112_i32_119 : i32 to vector<2x128xi32>
    %252 = arith.cmpi sge, %0, %251 : vector<2x128xi32>
    %c1_i32_120 = arith.constant 1 : i32
    %253 = tpu.dynamic_rotate %250 by %c1_i32_120 dim 0 : vector<2x128xf32>, i32 -> vector<2x128xf32>
    %254 = arith.select %252, %253, %250 : vector<2x128xi1>, vector<2x128xf32>
    %cst_121 = arith.constant 0.000000e+00 : f32
    %255 = vector.broadcast %cst_121 : f32 to vector<2x128xf32>
    %256 = arith.select %6, %255, %249 : vector<2x128xi1>, vector<2x128xf32>
    %cst_122 = arith.constant 0.000000e+00 : f32
    %257 = vector.broadcast %cst_122 : f32 to vector<2x128xf32>
    %258 = arith.select %11, %257, %254 : vector<2x128xi1>, vector<2x128xf32>
    %c6_123 = arith.constant 6 : index
    %259 = memref.load %arg7[%c6_123] : memref<36xf32, #tpu.memory_space<smem>>
    %260 = vector.broadcast %259 : f32 to vector<2x128xf32>
    %261 = arith.mulf %260, %256 : vector<2x128xf32>
    %c18 = arith.constant 18 : index
    %262 = memref.load %arg7[%c18] : memref<36xf32, #tpu.memory_space<smem>>
    %263 = vector.broadcast %262 : f32 to vector<2x128xf32>
    %264 = arith.mulf %263, %241 : vector<2x128xf32>
    %265 = arith.addf %261, %264 : vector<2x128xf32>
    %c30 = arith.constant 30 : index
    %266 = memref.load %arg7[%c30] : memref<36xf32, #tpu.memory_space<smem>>
    %267 = vector.broadcast %266 : f32 to vector<2x128xf32>
    %268 = arith.mulf %267, %258 : vector<2x128xf32>
    %269 = arith.addf %265, %268 : vector<2x128xf32>
    %c2_124 = arith.constant 2 : index
    %270 = memref.load %arg7[%c2_124] : memref<36xf32, #tpu.memory_space<smem>>
    %271 = vector.broadcast %270 : f32 to vector<2x128xf32>
    %272 = arith.mulf %271, %256 : vector<2x128xf32>
    %c14_125 = arith.constant 14 : index
    %273 = memref.load %arg7[%c14_125] : memref<36xf32, #tpu.memory_space<smem>>
    %274 = vector.broadcast %273 : f32 to vector<2x128xf32>
    %275 = arith.mulf %274, %241 : vector<2x128xf32>
    %276 = arith.addf %272, %275 : vector<2x128xf32>
    %c26 = arith.constant 26 : index
    %277 = memref.load %arg7[%c26] : memref<36xf32, #tpu.memory_space<smem>>
    %278 = vector.broadcast %277 : f32 to vector<2x128xf32>
    %279 = arith.mulf %278, %258 : vector<2x128xf32>
    %280 = arith.addf %276, %279 : vector<2x128xf32>
    %c1_i32_126 = arith.constant 1 : i32
    %281 = tpu.dynamic_rotate %280 by %c1_i32_126 dim 1 : vector<2x128xf32>, i32 -> vector<2x128xf32>
    %c1_i32_127 = arith.constant 1 : i32
    %282 = vector.broadcast %c1_i32_127 : i32 to vector<2x128xi32>
    %283 = arith.cmpi slt, %0, %282 : vector<2x128xi32>
    %c1_i32_128 = arith.constant 1 : i32
    %284 = tpu.dynamic_rotate %281 by %c1_i32_128 dim 0 : vector<2x128xf32>, i32 -> vector<2x128xf32>
    %285 = arith.select %283, %284, %281 : vector<2x128xi1>, vector<2x128xf32>
    %286 = arith.mulf %285, %12 : vector<2x128xf32>
    %287 = arith.addf %269, %286 : vector<2x128xf32>
    %c10_129 = arith.constant 10 : index
    %288 = memref.load %arg7[%c10_129] : memref<36xf32, #tpu.memory_space<smem>>
    %289 = vector.broadcast %288 : f32 to vector<2x128xf32>
    %290 = arith.mulf %289, %256 : vector<2x128xf32>
    %c22 = arith.constant 22 : index
    %291 = memref.load %arg7[%c22] : memref<36xf32, #tpu.memory_space<smem>>
    %292 = vector.broadcast %291 : f32 to vector<2x128xf32>
    %293 = arith.mulf %292, %241 : vector<2x128xf32>
    %294 = arith.addf %290, %293 : vector<2x128xf32>
    %c34 = arith.constant 34 : index
    %295 = memref.load %arg7[%c34] : memref<36xf32, #tpu.memory_space<smem>>
    %296 = vector.broadcast %295 : f32 to vector<2x128xf32>
    %297 = arith.mulf %296, %258 : vector<2x128xf32>
    %298 = arith.addf %294, %297 : vector<2x128xf32>
    %c127_i32_130 = arith.constant 127 : i32
    %299 = tpu.dynamic_rotate %298 by %c127_i32_130 dim 1 : vector<2x128xf32>, i32 -> vector<2x128xf32>
    %c127_i32_131 = arith.constant 127 : i32
    %300 = vector.broadcast %c127_i32_131 : i32 to vector<2x128xi32>
    %301 = arith.cmpi sge, %0, %300 : vector<2x128xi32>
    %c1_i32_132 = arith.constant 1 : i32
    %302 = tpu.dynamic_rotate %299 by %c1_i32_132 dim 0 : vector<2x128xf32>, i32 -> vector<2x128xf32>
    %303 = arith.select %301, %302, %299 : vector<2x128xi1>, vector<2x128xf32>
    %304 = arith.mulf %303, %13 : vector<2x128xf32>
    %305 = arith.addf %287, %304 : vector<2x128xf32>
    %c2_133 = arith.constant 2 : index
    %306 = memref.load %arg8[%c2_133] : memref<4xf32, #tpu.memory_space<smem>>
    %307 = vector.broadcast %306 : f32 to vector<2x128xf32>
    %308 = arith.addf %305, %307 : vector<2x128xf32>
    %cst_134 = arith.constant 0.000000e+00 : f32
    %309 = vector.broadcast %cst_134 : f32 to vector<2x128xf32>
    %310 = arith.maximumf %308, %309 : vector<2x128xf32>
    %c0_135 = arith.constant 0 : index
    %c6_136 = arith.constant 6 : index
    %c0_137 = arith.constant 0 : index
    %c0_138 = arith.constant 0 : index
    %311 = vector.load %arg9[%c0_135, %c6_136, %c0_137, %c0_138] : memref<1x8x2x128xf32, #tpu.memory_space<vmem>>, vector<1x1x2x128xf32>
    %312 = vector.shape_cast %311 : vector<1x1x2x128xf32> to vector<2x128xf32>
    %313 = vector.shape_cast %310 : vector<2x128xf32> to vector<1x1x2x128xf32>
    tpu.vector_store %arg9[%c0_135, %c6_136, %c0_137, %c0_138], %313 {strides = array<i32>} : memref<1x8x2x128xf32, #tpu.memory_space<vmem>>, vector<1x1x2x128xf32>,
    %c0_139 = arith.constant 0 : index
    %c0_140 = arith.constant 0 : index
    %c0_141 = arith.constant 0 : index
    %c0_142 = arith.constant 0 : index
    %314 = vector.load %arg2[%c0_139, %c0_140, %c0_141, %c0_142] : memref<1x4x2x128xf32, #tpu.memory_space<vmem>>, vector<1x1x2x128xf32>
    %315 = vector.shape_cast %314 : vector<1x1x2x128xf32> to vector<2x128xf32>
    %c3_143 = arith.constant 3 : index
    %316 = memref.load %arg5[%c3_143] : memref<16xf32, #tpu.memory_space<smem>>
    %317 = vector.broadcast %316 : f32 to vector<2x128xf32>
    %318 = arith.mulf %315, %317 : vector<2x128xf32>
    %c0_144 = arith.constant 0 : index
    %c1_145 = arith.constant 1 : index
    %c0_146 = arith.constant 0 : index
    %c0_147 = arith.constant 0 : index
    %319 = vector.load %arg2[%c0_144, %c1_145, %c0_146, %c0_147] : memref<1x4x2x128xf32, #tpu.memory_space<vmem>>, vector<1x1x2x128xf32>
    %320 = vector.shape_cast %319 : vector<1x1x2x128xf32> to vector<2x128xf32>
    %c7 = arith.constant 7 : index
    %321 = memref.load %arg5[%c7] : memref<16xf32, #tpu.memory_space<smem>>
    %322 = vector.broadcast %321 : f32 to vector<2x128xf32>
    %323 = arith.mulf %320, %322 : vector<2x128xf32>
    %324 = arith.addf %318, %323 : vector<2x128xf32>
    %c0_148 = arith.constant 0 : index
    %c2_149 = arith.constant 2 : index
    %c0_150 = arith.constant 0 : index
    %c0_151 = arith.constant 0 : index
    %325 = vector.load %arg2[%c0_148, %c2_149, %c0_150, %c0_151] : memref<1x4x2x128xf32, #tpu.memory_space<vmem>>, vector<1x1x2x128xf32>
    %326 = vector.shape_cast %325 : vector<1x1x2x128xf32> to vector<2x128xf32>
    %c11 = arith.constant 11 : index
    %327 = memref.load %arg5[%c11] : memref<16xf32, #tpu.memory_space<smem>>
    %328 = vector.broadcast %327 : f32 to vector<2x128xf32>
    %329 = arith.mulf %326, %328 : vector<2x128xf32>
    %330 = arith.addf %324, %329 : vector<2x128xf32>
    %c0_152 = arith.constant 0 : index
    %c3_153 = arith.constant 3 : index
    %c0_154 = arith.constant 0 : index
    %c0_155 = arith.constant 0 : index
    %331 = vector.load %arg2[%c0_152, %c3_153, %c0_154, %c0_155] : memref<1x4x2x128xf32, #tpu.memory_space<vmem>>, vector<1x1x2x128xf32>
    %332 = vector.shape_cast %331 : vector<1x1x2x128xf32> to vector<2x128xf32>
    %c15 = arith.constant 15 : index
    %333 = memref.load %arg5[%c15] : memref<16xf32, #tpu.memory_space<smem>>
    %334 = vector.broadcast %333 : f32 to vector<2x128xf32>
    %335 = arith.mulf %332, %334 : vector<2x128xf32>
    %336 = arith.addf %330, %335 : vector<2x128xf32>
    %c3_156 = arith.constant 3 : index
    %337 = memref.load %arg6[%c3_156] : memref<4xf32, #tpu.memory_space<smem>>
    %338 = vector.broadcast %337 : f32 to vector<2x128xf32>
    %339 = arith.addf %336, %338 : vector<2x128xf32>
    %cst_157 = arith.constant 0.000000e+00 : f32
    %340 = vector.broadcast %cst_157 : f32 to vector<2x128xf32>
    %341 = arith.maximumf %339, %340 : vector<2x128xf32>
    %c0_158 = arith.constant 0 : index
    %c3_159 = arith.constant 3 : index
    %c0_160 = arith.constant 0 : index
    %c0_161 = arith.constant 0 : index
    %342 = vector.load %arg9[%c0_158, %c3_159, %c0_160, %c0_161] : memref<1x8x2x128xf32, #tpu.memory_space<vmem>>, vector<1x1x2x128xf32>
    %343 = vector.shape_cast %342 : vector<1x1x2x128xf32> to vector<2x128xf32>
    %344 = vector.shape_cast %341 : vector<2x128xf32> to vector<1x1x2x128xf32>
    tpu.vector_store %arg9[%c0_158, %c3_159, %c0_160, %c0_161], %344 {strides = array<i32>} : memref<1x8x2x128xf32, #tpu.memory_space<vmem>>, vector<1x1x2x128xf32>,
    %c16_i32_162 = arith.constant 16 : i32
    %345 = tpu.dynamic_rotate %341 by %c16_i32_162 dim 1 : vector<2x128xf32>, i32 -> vector<2x128xf32>
    %c16_i32_163 = arith.constant 16 : i32
    %346 = vector.broadcast %c16_i32_163 : i32 to vector<2x128xi32>
    %347 = arith.cmpi slt, %0, %346 : vector<2x128xi32>
    %c1_i32_164 = arith.constant 1 : i32
    %348 = tpu.dynamic_rotate %345 by %c1_i32_164 dim 0 : vector<2x128xf32>, i32 -> vector<2x128xf32>
    %349 = arith.select %347, %348, %345 : vector<2x128xi1>, vector<2x128xf32>
    %c112_i32_165 = arith.constant 112 : i32
    %350 = tpu.dynamic_rotate %341 by %c112_i32_165 dim 1 : vector<2x128xf32>, i32 -> vector<2x128xf32>
    %c112_i32_166 = arith.constant 112 : i32
    %351 = vector.broadcast %c112_i32_166 : i32 to vector<2x128xi32>
    %352 = arith.cmpi sge, %0, %351 : vector<2x128xi32>
    %c1_i32_167 = arith.constant 1 : i32
    %353 = tpu.dynamic_rotate %350 by %c1_i32_167 dim 0 : vector<2x128xf32>, i32 -> vector<2x128xf32>
    %354 = arith.select %352, %353, %350 : vector<2x128xi1>, vector<2x128xf32>
    %cst_168 = arith.constant 0.000000e+00 : f32
    %355 = vector.broadcast %cst_168 : f32 to vector<2x128xf32>
    %356 = arith.select %6, %355, %349 : vector<2x128xi1>, vector<2x128xf32>
    %cst_169 = arith.constant 0.000000e+00 : f32
    %357 = vector.broadcast %cst_169 : f32 to vector<2x128xf32>
    %358 = arith.select %11, %357, %354 : vector<2x128xi1>, vector<2x128xf32>
    %c7_170 = arith.constant 7 : index
    %359 = memref.load %arg7[%c7_170] : memref<36xf32, #tpu.memory_space<smem>>
    %360 = vector.broadcast %359 : f32 to vector<2x128xf32>
    %361 = arith.mulf %360, %356 : vector<2x128xf32>
    %c19 = arith.constant 19 : index
    %362 = memref.load %arg7[%c19] : memref<36xf32, #tpu.memory_space<smem>>
    %363 = vector.broadcast %362 : f32 to vector<2x128xf32>
    %364 = arith.mulf %363, %341 : vector<2x128xf32>
    %365 = arith.addf %361, %364 : vector<2x128xf32>
    %c31 = arith.constant 31 : index
    %366 = memref.load %arg7[%c31] : memref<36xf32, #tpu.memory_space<smem>>
    %367 = vector.broadcast %366 : f32 to vector<2x128xf32>
    %368 = arith.mulf %367, %358 : vector<2x128xf32>
    %369 = arith.addf %365, %368 : vector<2x128xf32>
    %c3_171 = arith.constant 3 : index
    %370 = memref.load %arg7[%c3_171] : memref<36xf32, #tpu.memory_space<smem>>
    %371 = vector.broadcast %370 : f32 to vector<2x128xf32>
    %372 = arith.mulf %371, %356 : vector<2x128xf32>
    %c15_172 = arith.constant 15 : index
    %373 = memref.load %arg7[%c15_172] : memref<36xf32, #tpu.memory_space<smem>>
    %374 = vector.broadcast %373 : f32 to vector<2x128xf32>
    %375 = arith.mulf %374, %341 : vector<2x128xf32>
    %376 = arith.addf %372, %375 : vector<2x128xf32>
    %c27 = arith.constant 27 : index
    %377 = memref.load %arg7[%c27] : memref<36xf32, #tpu.memory_space<smem>>
    %378 = vector.broadcast %377 : f32 to vector<2x128xf32>
    %379 = arith.mulf %378, %358 : vector<2x128xf32>
    %380 = arith.addf %376, %379 : vector<2x128xf32>
    %c1_i32_173 = arith.constant 1 : i32
    %381 = tpu.dynamic_rotate %380 by %c1_i32_173 dim 1 : vector<2x128xf32>, i32 -> vector<2x128xf32>
    %c1_i32_174 = arith.constant 1 : i32
    %382 = vector.broadcast %c1_i32_174 : i32 to vector<2x128xi32>
    %383 = arith.cmpi slt, %0, %382 : vector<2x128xi32>
    %c1_i32_175 = arith.constant 1 : i32
    %384 = tpu.dynamic_rotate %381 by %c1_i32_175 dim 0 : vector<2x128xf32>, i32 -> vector<2x128xf32>
    %385 = arith.select %383, %384, %381 : vector<2x128xi1>, vector<2x128xf32>
    %386 = arith.mulf %385, %12 : vector<2x128xf32>
    %387 = arith.addf %369, %386 : vector<2x128xf32>
    %c11_176 = arith.constant 11 : index
    %388 = memref.load %arg7[%c11_176] : memref<36xf32, #tpu.memory_space<smem>>
    %389 = vector.broadcast %388 : f32 to vector<2x128xf32>
    %390 = arith.mulf %389, %356 : vector<2x128xf32>
    %c23 = arith.constant 23 : index
    %391 = memref.load %arg7[%c23] : memref<36xf32, #tpu.memory_space<smem>>
    %392 = vector.broadcast %391 : f32 to vector<2x128xf32>
    %393 = arith.mulf %392, %341 : vector<2x128xf32>
    %394 = arith.addf %390, %393 : vector<2x128xf32>
    %c35 = arith.constant 35 : index
    %395 = memref.load %arg7[%c35] : memref<36xf32, #tpu.memory_space<smem>>
    %396 = vector.broadcast %395 : f32 to vector<2x128xf32>
    %397 = arith.mulf %396, %358 : vector<2x128xf32>
    %398 = arith.addf %394, %397 : vector<2x128xf32>
    %c127_i32_177 = arith.constant 127 : i32
    %399 = tpu.dynamic_rotate %398 by %c127_i32_177 dim 1 : vector<2x128xf32>, i32 -> vector<2x128xf32>
    %c127_i32_178 = arith.constant 127 : i32
    %400 = vector.broadcast %c127_i32_178 : i32 to vector<2x128xi32>
    %401 = arith.cmpi sge, %0, %400 : vector<2x128xi32>
    %c1_i32_179 = arith.constant 1 : i32
    %402 = tpu.dynamic_rotate %399 by %c1_i32_179 dim 0 : vector<2x128xf32>, i32 -> vector<2x128xf32>
    %403 = arith.select %401, %402, %399 : vector<2x128xi1>, vector<2x128xf32>
    %404 = arith.mulf %403, %13 : vector<2x128xf32>
    %405 = arith.addf %387, %404 : vector<2x128xf32>
    %c3_180 = arith.constant 3 : index
    %406 = memref.load %arg8[%c3_180] : memref<4xf32, #tpu.memory_space<smem>>
    %407 = vector.broadcast %406 : f32 to vector<2x128xf32>
    %408 = arith.addf %405, %407 : vector<2x128xf32>
    %cst_181 = arith.constant 0.000000e+00 : f32
    %409 = vector.broadcast %cst_181 : f32 to vector<2x128xf32>
    %410 = arith.maximumf %408, %409 : vector<2x128xf32>
    %c0_182 = arith.constant 0 : index
    %c7_183 = arith.constant 7 : index
    %c0_184 = arith.constant 0 : index
    %c0_185 = arith.constant 0 : index
    %411 = vector.load %arg9[%c0_182, %c7_183, %c0_184, %c0_185] : memref<1x8x2x128xf32, #tpu.memory_space<vmem>>, vector<1x1x2x128xf32>
    %412 = vector.shape_cast %411 : vector<1x1x2x128xf32> to vector<2x128xf32>
    %413 = vector.shape_cast %410 : vector<2x128xf32> to vector<1x1x2x128xf32>
    tpu.vector_store %arg9[%c0_182, %c7_183, %c0_184, %c0_185], %413 {strides = array<i32>} : memref<1x8x2x128xf32, #tpu.memory_space<vmem>>, vector<1x1x2x128xf32>,
    return
  }
  func.func @transform_0(%arg0: i32, %arg1: i32) -> (i32, i32, i32, i32) {
    %c0_i32 = arith.constant 0 : i32
    %c0_i32_0 = arith.constant 0 : i32
    %c0_i32_1 = arith.constant 0 : i32
    return %arg0, %c0_i32, %arg1, %c0_i32_0 : i32, i32, i32, i32
  }
  func.func @transform_1(%arg0: i32, %arg1: i32) -> (i32, i32) {
    %c0_i32 = arith.constant 0 : i32
    %c0_i32_0 = arith.constant 0 : i32
    %c0_i32_1 = arith.constant 0 : i32
    return %c0_i32, %c0_i32_0 : i32, i32
  }
  func.func @transform_2(%arg0: i32, %arg1: i32) -> (i32, i32) {
    %c0_i32 = arith.constant 0 : i32
    %c0_i32_0 = arith.constant 0 : i32
    %c0_i32_1 = arith.constant 0 : i32
    return %c0_i32, %c0_i32_0 : i32, i32
  }
  func.func @transform_3(%arg0: i32, %arg1: i32) -> i32 {
    %c0_i32 = arith.constant 0 : i32
    %c0_i32_0 = arith.constant 0 : i32
    return %c0_i32 : i32
  }
  func.func @transform_4(%arg0: i32, %arg1: i32) -> i32 {
    %c0_i32 = arith.constant 0 : i32
    %c0_i32_0 = arith.constant 0 : i32
    return %c0_i32 : i32
  }
  func.func @transform_5(%arg0: i32, %arg1: i32) -> i32 {
    %c0_i32 = arith.constant 0 : i32
    %c0_i32_0 = arith.constant 0 : i32
    return %c0_i32 : i32
  }
  func.func @transform_6(%arg0: i32, %arg1: i32) -> i32 {
    %c0_i32 = arith.constant 0 : i32
    %c0_i32_0 = arith.constant 0 : i32
    return %c0_i32 : i32
  }
  func.func @transform_7(%arg0: i32, %arg1: i32) -> (i32, i32, i32, i32) {
    %c0_i32 = arith.constant 0 : i32
    %c0_i32_0 = arith.constant 0 : i32
    %c0_i32_1 = arith.constant 0 : i32
    return %arg0, %c0_i32, %arg1, %c0_i32_0 : i32, i32, i32, i32
  }
}

</mosaic_0001>

<bundles_post_ra>
// kernel: ghost_module_forward.1
= control target key start
LH: loop header
LB: loop body
LE: loop exit
PB: predicated region body
PF: predicated region fallthrough
CT: control target
= control target key end

     0   :  { %s1848_s0 = inlined_call_operand.vmem [shape: f32[2,4,2,128], index: 0, kind: input, shape index: {}]   ;;  %s1849_s1 = inlined_call_operand.vmem [shape: f32[2,128], index: 1, kind: input, shape index: {}]   ;;  %s1850_s2 = inlined_call_operand.vmem [shape: f32[2,128], index: 2, kind: input, shape index: {}]   ;;  %s1851_s3 = inlined_call_operand.vmem [shape: f32[16], index: 3, kind: input, shape index: {}]   ;;  %s1852_s4 = inlined_call_operand.vmem [shape: f32[4], index: 4, kind: input, shape index: {}]   ;;  %s1853_s5 = inlined_call_operand.vmem [shape: f32[36], index: 5, kind: input, shape index: {}]   ;;  %s1854_s6 = inlined_call_operand.vmem [shape: f32[4], index: 6, kind: input, shape index: {}]   ;;  %s1855_s7 = inlined_call_operand.vmem [shape: f32[2,8,2,128], index: 7, kind: output, shape index: {}]  }
   0x1   :  { %1860 = sst [smem:[#allocation14_spill]] %s1848_s0 }
   0x2   :  { %1861 = sst [smem:[#allocation15_spill]] %s1851_s3 }
   0x3   :  { %1862 = sst [smem:[#allocation16_spill]] %s1852_s4 }
   0x4   :  { %1863 = sst [smem:[#allocation17_spill]] %s1853_s5 }
   0x5   :  { %1864 = sst [smem:[#allocation18_spill]] %s1854_s6 }
   0x6   :  { %12 = vsyncpa [#allocation3], 0 }
   0x7   :  { %13 = vsyncpa [#allocation5], 0 }
   0x8   :  { %14 = vsyncpa [#allocation8], 0  ;;  %s1307_s24 = smov 0   ;;  %s1309_s25 = smov 0  }
   0x9   :  { %s1311_s26 = smov 0  }
   0xa LB: > { %1865 = sst [smem:[#allocation12_spill]] %s1253_s25  ;;  %s1866_s4 = sld [smem:[#allocation16_spill]]  ;;  %s1257_s26 = sphi %s1311_s26, %s20_s26   ;;  %s1253_s25 = sphi %s1309_s25, %s1883_s25   ;;  %s1249_s24 = sphi %s1307_s24, %s1882_s24  }
   0xb   : > { %s998_s30 = sadd.s32 4294967295, %s1257_s26   ;;  %p1000_p0 = scmp.ge.s32.totalorder %s1257_s26, 1 }
   0xc   : > { %p219_p1 = scmp.lt.s32.totalorder %s1257_s26, 3  ;;  %p1328_p2 = scmp.eq.s32.totalorder %s998_s30, 0 }
   0xd   : > { %s32_s10 = sadd.s32 1, %s1253_s25  ;;  %s1869_s3 = sld [smem:[#allocation15_spill]] }
   0xe   : > { %s1867_s8 = scalar_select %p1328_p2, 1, 0 }
   0xf   : > { %p1332_p3 = pnand %p1000_p0, %p219_p1  ;;  %p1348_p6 = scmp.ge.s32.totalorder %s32_s10, 2 }
  0x10   : > { %s249_s29 = sshll.u32 %s1866_s4, 4  ;;  %s1872_s5 = sld [smem:[#allocation17_spill]]  ;;  %s250_s29 = int_to_ptr.vmem [resolvable:$true] %s249_s29 }
  0x11   : > { %s1868_s9 = scalar_select %p1332_p3, 1, 0 }
  0x12   : > { %p1110_p4 = pneg %p1332_p3  ;;  %s1163_s19 = scalar_lea.vmem %s250_s29, 16 }
  0x13   : > { %s238_s13 = sshll.u32 %s1869_s3, 4  ;;  %p1164_p7 = scmp.ne.s32.totalorder %s250_s29, %s1163_s19  ;;  %s239_s13 = int_to_ptr.vmem [resolvable:$true] %s238_s13 }
  0x14   : > { %p1344_p5 = pnand %p1328_p2, %p1110_p4  ;;  %p1171_p11 = scmp.lt.s32.totalorder %s250_s29, %s250_s29 }
  0x15   : > { %p1172_p12 = scmp.lt.s32.totalorder %s1163_s19, %s1163_s19 }
  0x16   : > { %s260_s18 = sshll.u32 %s1872_s5, 4  ;;  %p1165_p8 = pneg %p1344_p5  ;;  %s261_s18 = int_to_ptr.vmem [resolvable:$true] %s260_s18 }
  0x17   : > { %p1173_p13 = por %p1172_p12, %p1171_p11 }
  0x18   : > { %p1166_p9 = pnand %p1165_p8, %p1164_p7 }
  0x1a   : > { %p1167_p10 = pneg %p1166_p9 }
  0x1c   : > { %p1174_p0 = pnand %p1173_p13, %p1167_p10 }
  0x1e   : > { %1177 = shalt.err (!%p1174_p0)
}
  0x1f   : > { %s1259_s20 = smov [#allocation4]   ;;  %s1885_s10 = smov (%p1348_p6, %s32_s10), 0 }
  0x20   : > { %1116 = dma.vmem_to_smem (!%p1344_p5), %s250_s29, 16, %s1259_s20, [#allocation5]  }
  0x21   : > { %1873 = sst [smem:[#allocation13_spill]] %s1885_s10  ;;  %s1178_s21 = scalar_lea.vmem %s239_s13, 16 }
  0x22   : > { %p1179_p1 = scmp.ne.s32.totalorder %s239_s13, %s1178_s21  ;;  %p1186_p9 = scmp.lt.s32.totalorder %s239_s13, %s239_s13 }
  0x23   : > { %p1187_p2 = scmp.lt.s32.totalorder %s1178_s21, %s1178_s21 }
  0x24   : > { %p1181_p4 = pnand %p1179_p1, %p1165_p8 }
  0x25   : > { %p1188_p11 = por %p1187_p2, %p1186_p9 }
  0x26   : > { %p1182_p7 = pneg %p1181_p4 }
  0x28   : > { %p1189_p10 = pnand %p1188_p11, %p1182_p7 }
  0x2a   : > { %1192 = shalt.err (!%p1189_p10)
}
  0x2b   : > { %s1260_s22 = smov [#allocation2]   ;;  %s1193_s23 = scalar_lea.vmem %s261_s18, 16 }
  0x2c   : > { %1113 = dma.vmem_to_smem (!%p1344_p5), %s239_s13, 16, %s1260_s22, [#allocation3]  }
  0x2d   : > { %p1194_p6 = scmp.ne.s32.totalorder %s261_s18, %s1193_s23  ;;  %p1201_p0 = scmp.lt.s32.totalorder %s261_s18, %s261_s18 }
  0x2e   : > { %p1202_p1 = scmp.lt.s32.totalorder %s1193_s23, %s1193_s23 }
  0x2f   : > { %p1196_p12 = pnand %p1194_p6, %p1165_p8 }
  0x30   : > { %p1203_p4 = por %p1202_p1, %p1201_p0 }
  0x31   : > { %p1197_p13 = pneg %p1196_p12 }
  0x33   : > { %p1204_p3 = pnand %p1203_p4, %p1197_p13 }
  0x35   : > { %1207 = shalt.err (!%p1204_p3)
}
  0x36   : > { %s1261_s27 = smov [#allocation6]   ;;  %s1874_s6 = sld [smem:[#allocation18_spill]] }
  0x37   : > { %1119 = dma.vmem_to_smem (!%p1344_p5), %s261_s18, 16, %s1261_s27, [#allocation5]  }
  0x3c   : > { %s271_s30 = sshll.u32 %s1874_s6, 4  ;;  %s272_s30 = int_to_ptr.vmem [resolvable:$true] %s271_s30 }
  0x3d   : > { %s1208_s11 = scalar_lea.vmem %s272_s30, 16  ;;  %p1216_p11 = scmp.lt.s32.totalorder %s272_s30, %s272_s30 }
  0x3e   : > { %p1209_p2 = scmp.ne.s32.totalorder %s272_s30, %s1208_s11  ;;  %p1217_p10 = scmp.lt.s32.totalorder %s1208_s11, %s1208_s11 }
  0x40   : > { %p1211_p7 = pnand %p1209_p2, %p1165_p8  ;;  %p1218_p6 = por %p1217_p10, %p1216_p11 }
  0x42   : > { %p1212_p9 = pneg %p1211_p7 }
  0x44   : > { %p1219_p3 = pnand %p1218_p6, %p1212_p9 }
  0x46   : > { %1222 = shalt.err (!%p1219_p3)
}
  0x47   : > { %s1262_s12 = smov [#allocation7]   ;;  %p1875_p12 = scmp.ne.s32.totalorder %s1868_s9, 0 }
  0x48   : > { %1122 = dma.vmem_to_smem (!%p1344_p5), %s272_s30, 16, %s1262_s12, [#allocation8]  }
  0x49   : > { %295 = sbr.rel (%p1875_p12) target bundleno = 398 (0x18e), region = 48  ;;  %p1876_p13 = scmp.ne.s32.totalorder (!%p1875_p12), %s1867_s8, 0 }
  0x50   : > { %1236 = dma.done.wait (%p1876_p13), [#allocation3], 16  }
  0x51   : > { %1238 = vsyncadd (%p1876_p13), [#allocation3], 4294967280 }
  0x52   : > { %1240 = dma.done.wait (%p1876_p13), [#allocation5], 32  }
  0x53   : > { %1242 = vsyncadd (%p1876_p13), [#allocation5], 4294967264 }
  0x54   : > { %1244 = dma.done.wait (%p1876_p13), [#allocation8], 16  }
  0x55   : > { %1246 = vsyncadd (%p1876_p13), [#allocation8], 4294967280 }
  0x56   : > { %313 = sfence }
  0x57   : > { %p346_p5 = scmp.lt.s32.totalorder %s1249_s24, 1  ;;  %s1050_s9 = sld [smem:[#allocation2 + $0x2]]  ;;  %vm403_vm1 = vcmask 1047554  }
  0x58   : > { %s1052_s13 = sld [smem:[#allocation2 + $0x6]]  ;;  %s1054_s14 = sld [smem:[#allocation2 + $0xa]] }
  0x59   : > { %s1887_s24 = smov (!%p346_p5, %s1249_s24), 1  ;;  %s1056_s15 = sld [smem:[#allocation2 + $0xe]] }
  0x5a   : > { %s1092_s16 = sshll.u32 %s1887_s24, 3  ;;  %s1403_s17 = sld [smem:[#allocation4 + $0x2]] }
  0x5b   : > { %s1877_s0 = sld [smem:[#allocation14_spill]]  ;;  %s375_s8 = sld [smem:[#allocation2]] }
  0x5c   : > { %s1016_s21 = sld [smem:[#allocation2 + $0x4]]  ;;  %s1018_s22 = sld [smem:[#allocation2 + $0x8]] }
  0x5d   : > { %v631_v2 = vstv %s1050_s9  ;;  %s1415_s23 = sld [smem:[#allocation2 + $0xc]]  ;;  %s1417_s27 = sld [smem:[#allocation4]] }
  0x5e   : > { %v635_v3 = vstv %s1052_s13  ;;  %v640_v8 = vstv %s1054_s14  ;;  %s1070_s28 = sld [smem:[#allocation2 + $0x3]]  ;;  %s1420_s29 = sld [smem:[#allocation2 + $0x7]] }
  0x5f   : > { %v645_v9 = vstv %s1056_s15  ;;  %s1422_s30 = sld [smem:[#allocation2 + $0xb]]  ;;  %s1425_s11 = sld [smem:[#allocation2 + $0xf]] }
  0x60   : > { %v649_v19 = vstv %s1403_s17  ;;  %s1430_s12 = sld [smem:[#allocation2 + $0x1]]  ;;  %s1433_s9 = sld [smem:[#allocation2 + $0x5]] }
  0x61   : > { %s1408_s20 = scalar_lea.vmem %s1877_s0, %s1092_s16  ;;  %v376_v14 = vstv %s375_s8  ;;  %s1435_s13 = sld [smem:[#allocation2 + $0x9]] }
  0x62   : > { %v629_v0 = vld [vmem:[%s1408_s20] sm:$0x3]  ;;  %v1051_v1 = vld [vmem:[%s1408_s20 + $0x2] sm:$0x3]  ;;  %v1053_v4 = vld [vmem:[%s1408_s20 + $0x4] sm:$0x3]  ;;  %v381_v20 = vstv %s1016_s21 }
  0x63   : > { %v1055_v5 = vld [vmem:[%s1408_s20 + $0x6] sm:$0x3]  ;;  %v632_v6 = vmul.f32 %v631_v2, %v629_v0  ;;  %v636_v7 = vmul.f32 %v1051_v1, %v635_v3  ;;  %v374_v10 = vld [vmem:[%s1408_s20] sm:$0x3]  ;;  %v641_v12 = vmul.f32 %v1053_v4, %v640_v8  ;;  %v1015_v15 = vld [vmem:[%s1408_s20 + $0x2] sm:$0x3]  ;;  %v387_v25 = vstv %s1018_s22 }
  0x64   : > { %v646_v13 = vmul.f32 %v1055_v5, %v645_v9  ;;  %v377_v17 = vmul.f32 %v376_v14, %v374_v10  ;;  %v1017_v18 = vld [vmem:[%s1408_s20 + $0x4] sm:$0x3]  ;;  %v1019_v21 = vld [vmem:[%s1408_s20 + $0x6] sm:$0x3]  ;;  %v751_v22 = vld [vmem:[%s1408_s20] sm:$0x3]  ;;  %v382_v24 = vmul.f32 %v1015_v15, %v381_v20  ;;  %v393_v28 = vstv %s1415_s23 }
  0x65   : > { %v637_v11 = vadd.f32 %v636_v7, %v632_v6  ;;  %v1071_v26 = vld [vmem:[%s1408_s20 + $0x2] sm:$0x3]  ;;  %v388_v27 = vmul.f32 %v1017_v18, %v387_v25  ;;  %v1073_v29 = vld [vmem:[%s1408_s20 + $0x4] sm:$0x3]  ;;  %s1439_s14 = sld [smem:[#allocation4 + $0x3]]  ;;  %s1441_s15 = sld [smem:[#allocation2 + $0xd]]  ;;  %v394_v32 = vmul.f32 %v1019_v21, %v393_v28  ;;  %v753_v33 = vstv %s1070_s28 }
  0x66   : > { %v383_v31 = vadd.f32 %v382_v24, %v377_v17  ;;  %v754_v34 = vmul.f32 %v753_v33, %v751_v22  ;;  %v757_v35 = vstv %s1420_s29  ;;  %v762_v36 = vstv %s1422_s30  ;;  %v1075_v37 = vld [vmem:[%s1408_s20 + $0x6] sm:$0x3]  ;;  %v507_v38 = vld [vmem:[%s1408_s20] sm:$0x3]  ;;  %s1037_s16 = sld [smem:[#allocation4 + $0x1]]  ;;  %s1263_s17 = smov 16  }
  0x67   : > { %v642_v16 = vadd.f32 %v641_v12, %v637_v11  ;;  %v758_v41 = vmul.f32 %v1071_v26, %v757_v35  ;;  %v763_v42 = vmul.f32 %v1073_v29, %v762_v36  ;;  %v1031_v43 = vld [vmem:[%s1408_s20 + $0x2] sm:$0x3]  ;;  %v397_v44 = vstv %s1417_s27  ;;  %v1033_v47 = vld [vmem:[%s1408_s20 + $0x4] sm:$0x3]  ;;  %v1035_v54 = vld [vmem:[%s1408_s20 + $0x6] sm:$0x3] }
  0x68   : > { %v389_v40 = vadd.f32 %v388_v27, %v383_v31  ;;  %v767_v45 = vstv %s1425_s11  ;;  %v509_v46 = vstv %s1430_s12  ;;  %v513_v52 = vstv %s1433_s9  ;;  %s1264_s18 = smov 112   ;;  %s1473_s19 = sld [smem:[#allocation6 + $0x4]] }
  0x69   : > { %v647_v23 = vadd.f32 %v646_v13, %v642_v16  ;;  %v759_v49 = vadd.f32 %v758_v41, %v754_v34  ;;  %v768_v50 = vmul.f32 %v1075_v37, %v767_v45  ;;  %v510_v51 = vmul.f32 %v509_v46, %v507_v38  ;;  %s1475_s20 = sld [smem:[#allocation6 + $0x10]]  ;;  %s1479_s21 = sld [smem:[#allocation6 + $0xc]] }
  0x6a   : > { %v395_v48 = vadd.f32 %v394_v32, %v389_v40  ;;  %v518_v53 = vstv %s1435_s13  ;;  %v514_v58 = vmul.f32 %v1031_v43, %v513_v52  ;;  %v362_v8 = vlaneseq  ;;  %s1477_s8 = sld [smem:[#allocation6]]  ;;  %s1481_s22 = sld [smem:[#allocation6 + $0x5]] }
  0x6b   : > { %v650_v30 = vadd.f32 %v649_v19, %v647_v23  ;;  %v523_v55 = vstv %s1441_s15  ;;  %v764_v57 = vadd.f32 %v763_v42, %v759_v49  ;;  %v519_v59 = vmul.f32 %v1033_v47, %v518_v53  ;;  %s1483_s23 = sld [smem:[#allocation6 + $0x13]]  ;;  %s1485_s27 = sld [smem:[#allocation6 + $0x11]] }
  0x6c   : > { %v398_v56 = vadd.f32 %v397_v44, %v395_v48  ;;  %v771_v60 = vstv %s1439_s14  ;;  %v515_v63 = vadd.f32 %v514_v58, %v510_v51  ;;  %v524_v0 = vmul.f32 %v1035_v54, %v523_v55  ;;  %s1487_s28 = sld [smem:[#allocation6 + $0xd]]  ;;  %s1489_s29 = sld [smem:[#allocation6 + $0x1]] }
  0x6d   : > { %v1447_v39 = vmax.f32 %v650_v30, 0.0  ;;  %v769_v62 = vadd.f32 %v768_v50, %v764_v57  ;;  %v527_v3 = vstv %s1037_s16  ;;  %s1491_s30 = sld [smem:[#allocation6 + $0xf]]  ;;  %v1493_v9 = vand.u32 127, %v362_v8  ;;  %s1497_s12 = sld [smem:[#allocation6 + $0x3]] }
  0x6e   : > { %v1460_v61 = vmax.f32 %v398_v56, 0.0  ;;  %v520_v2 = vadd.f32 %v519_v59, %v515_v63  ;;  %s1495_s11 = sld [smem:[#allocation6 + $0x7]]  ;;  %v1499_v10 = vshrl.u32 %v362_v8, 7  ;;  %s1501_s9 = sld [smem:[#allocation6 + $0x1d]]  ;;  %v431_v14 = vstv %s1473_s19 }
  0x6f   : > { %654 = vrot.lane.b32.xlu1 %v1447_v39, %s1263_s17  ;;  %v772_v1 = vadd.f32 %v771_v60, %v769_v62  ;;  %s1503_s13 = sld [smem:[#allocation6 + $0x6]]  ;;  %s1505_s14 = sld [smem:[#allocation6 + $0x19]]  ;;  %vm367_vm0 = vcmp.lt.s32.totalorder %v1493_v9, 16  ;;  %v434_v11 = vstv %s1475_s20  ;;  %v445_v12 = vstv %s1479_s21 }
  0x70   : > { %401 = vrot.lane.b32.xlu0 %v1460_v61, %s1263_s17  ;;  %v525_v5 = vadd.f32 %v524_v0, %v520_v2  ;;  %s1507_s15 = sld [smem:[#allocation6 + $0x12]]  ;;  %s1509_s16 = sld [smem:[#allocation6 + $0xe]]  ;;  %vm366_vm2 = vcmp.eq.s32.totalorder %v1499_v10, 0  ;;  %v442_v15 = vstv %s1477_s8  ;;  %v561_v18 = vstv %s1481_s22 }
  0x71   : > { %v1463_v4 = vmax.f32 %v772_v1, 0.0  ;;  %s1518_s0 = sld [smem:[#allocation6 + $0x14]]  ;;  %s1523_s3 = sld [smem:[#allocation6 + $0x18]]  ;;  %v808_v16 = vstv %s1483_s23  ;;  %v564_v19 = vstv %s1485_s27  ;;  %v1535_v22 = vmul.f32 %v445_v12, %v1460_v61  ;;  %vm1587_vm3 = vmand %vm366_vm2, %vm367_vm0 }
  0x72   : > { %v528_v6 = vadd.f32 %v527_v3, %v525_v5  ;;  %s1526_s4 = sld [smem:[#allocation6 + $0x2]]  ;;  %v575_v20 = vstv %s1487_s28  ;;  %s1531_s20 = sld [smem:[#allocation6 + $0x9]]  ;;  %v572_v21 = vstv %s1489_s29  ;;  %v1538_v23 = vmul.f32 %v434_v11, %v1460_v61 }
  0x73   : > { %776 = vrot.lane.b32.xlu1 %v1463_v4, %s1263_s17  ;;  %v819_v24 = vstv %s1491_s30  ;;  %s1541_s21 = sld [smem:[#allocation6 + $0x8]]  ;;  %v1546_v27 = vmul.f32 %v808_v16, %v1463_v4  ;;  %v816_v28 = vstv %s1497_s12  ;;  %s1549_s23 = sld [smem:[#allocation6 + $0xb]]  ;;  %vm370_vm4 = vcmp.ge.s32.totalorder %v1493_v9, 112 }
  0x74   : > { %v1466_v7 = vmax.f32 %v528_v6, 0.0  ;;  %v805_v26 = vstv %s1495_s11  ;;  %s1551_s27 = sld [smem:[#allocation6 + $0x17]]  ;;  %v568_v31 = vstv %s1501_s9  ;;  %s1562_s30 = sld [smem:[#allocation6 + $0x21]]  ;;  %v1566_v35 = vmul.f32 %v819_v24, %v1463_v4 }
  0x75   : > { %s1560_s28 = sld [smem:[#allocation6 + $0x1f]]  ;;  %v579_v34 = vstv %s1505_s14  ;;  %s1568_s5 = sld [smem:[#allocation6 + $0x1b]]  ;;  %v683_v40 = vstv %s1503_s13  ;;  %vm369_vm5 = vcmp.eq.s32.totalorder %v1499_v10, 1  ;;  %vm454_vm7 = vcmp.lt.s32.totalorder %v1493_v9, 1 }
  0x76   : > { %532 = vrot.lane.b32.xlu0 %v1466_v7, %s1263_s17  ;;  %s1511_s17 = sld [smem:[#allocation6 + $0x15]]  ;;  %v1554_v30 = vmul.f32 %v564_v19, %v1466_v7  ;;  %v1558_v32 = vmul.f32 %v575_v20, %v1466_v7  ;;  %v686_v36 = vstv %s1507_s15  ;;  %s1571_s6 = sld [smem:[#allocation6 + $0x1e]]  ;;  %v697_v41 = vstv %s1509_s16  ;;  %vm1660_vm6 = vmand %vm369_vm5, %vm370_vm4 }
  0x77   : > { %542 = vrot.lane.b32.xlu1 %v1466_v7, %s1264_s18  ;;  %s1576_s10 = sld [smem:[#allocation6 + $0x1a]]  ;;  %s1579_s25 = sld [smem:[#allocation6 + $0x20]]  ;;  %v475_v47 = vstv %s1518_s0  ;;  %v449_v49 = vstv %s1523_s3  ;;  %v687_v50 = vmul.f32 %v686_v36, %v1447_v39  ;;  %v1598_v53 = vmul.f32 %v697_v41, %v1447_v39 }
  0x78   : > { %v694_v51 = vstv %s1526_s4  ;;  %v598_v54 = vstv %s1531_s20  ;;  %v1612_v60 = vmul.f32 %v475_v47, %v1460_v61  ;;  %s1682_s0 = sld [smem:[#allocation6 + $0xa]]  ;;  %s1686_s4 = sld [smem:[#allocation6 + $0x16]]  ;;  %vm484_vm8 = vcmp.ge.s32.totalorder %v1493_v9, 127 }
  0x79   : > { %v472_v59 = vstv %s1541_s21  ;;  %v842_v0 = vstv %s1549_s23  ;;  %s1698_s19 = sld [smem:[#allocation6 + $0x23]]  ;;  %s1706_s8 = sld [smem:[#allocation6 + $0x22]] }
  0x7a   : > { %412 = vrot.lane.b32.xlu0 %v1460_v61, %s1264_s18  ;;  %v845_v1 = vstv %s1551_s27  ;;  %v605_v6 = vstv %s1562_s30  ;;  %s1265_s3 = smov 1   ;;  %s1785_s11 = sld [smem:[#allocation7 + $0x1]] }
  0x7b   : > { %786 = vrot.lane.b32.xlu1 %v1463_v4, %s1264_s18  ;;  %v812_v3 = vstv %s1560_s28  ;;  %v823_v12 = vstv %s1568_s5  ;;  %s1093_s5 = sshll.u32 %s1887_s24, 4  ;;  %s1266_s24 = smov 127  }
  0x7c   : > { %v601_v42 = vstv %s1511_s17  ;;  %s1750_s29 = scalar_lea.vmem %s1855_s7, %s1093_s5  ;;  %s1807_s13 = sld [smem:[#allocation7]] }
  0x7d   : > { %v1602_v55 = vmul.f32 %v601_v42, %v1466_v7  ;;  %v701_v24 = vstv %s1576_s10  ;;  %1038 = vst [vmem:[%s1750_s29 + $0x2] sm:$0x3] %v1466_v7  ;;  %1058 = vst [vmem:[%s1750_s29 + $0x4] sm:$0x3] %v1447_v39  ;;  %s1813_s14 = sld [smem:[#allocation7 + $0x3]]  ;;  %s1820_s15 = sld [smem:[#allocation7 + $0x2]] }
  0x7e   : > { %664 = vrot.lane.b32.xlu0 %v1447_v39, %s1264_s18  ;;  %s1515_s18 = sld [smem:[#allocation6 + $0x1c]]  ;;  %1078 = vst [vmem:[%s1750_s29 + $0x6] sm:$0x3] %v1463_v4  ;;  %400 = vst [vmem:[%s1750_s29] sm:$0x3] %v1460_v61 }
  0x84   : > { %v438_v46 = vstv %s1515_s18 }
  0xe1   : > { %v655_v13 = vpop.permute.xlu1 %654 }
  0xe2   : > { %v656_v17 = vrot.slane %v655_v13, 6  ;;  %v661_v33 = vrot.slane %v655_v13, 7  ;;  %v402_v38 = vpop.permute.xlu0 %401 }
  0xe3   : > { %v404_v44 = vrot.slane %v402_v38, 6  ;;  %v409_v62 = vrot.slane %v402_v38, 7 }
  0xe4   : > { %v657_v25 = vsel %vm403_vm1, %v656_v17, %v655_v13 }
  0xe5   : > { %v658_v29 = vrot.slane %v657_v25, 6  ;;  %v405_v52 = vsel %vm403_vm1, %v404_v44, %v402_v38  ;;  %v777_v57 = vpop.permute.xlu1 %776  ;;  %v479_v25 = vstv %s1579_s25 }
  0xe6   : > { %v406_v56 = vrot.slane %v405_v52, 6  ;;  %v778_v63 = vrot.slane %v777_v57, 6 }
  0xe7   : > { %v659_v37 = vsel %vm403_vm1, %v658_v29, %v655_v13  ;;  %v690_v13 = vstv %s1571_s6  ;;  %v783_v29 = vrot.slane %v777_v57, 7 }
  0xe8   : > { %v663_v43 = vsel %vm367_vm0, %v659_v37, %v661_v33  ;;  %v407_v2 = vsel %vm403_vm1, %v406_v56, %v402_v38  ;;  %v779_v11 = vsel %vm403_vm1, %v778_v63, %v777_v57  ;;  %v533_v19 = vpop.permute.xlu0 %532 }
  0xe9   : > { %v675_v48 = vrot.slane %v663_v43, 1  ;;  %v411_v8 = vsel %vm367_vm0, %v407_v2, %v409_v62  ;;  %v780_v17 = vrot.slane %v779_v11, 6  ;;  %v543_v20 = vpop.permute.xlu1 %542  ;;  %v534_v33 = vrot.slane %v533_v19, 6 }
  0xea   : > { %v423_v16 = vrot.slane %v411_v8, 1  ;;  %v544_v36 = vrot.slane %v543_v20, 6 }
  0xeb   : > { %v1608_v58 = vsel %vm1587_vm3, 0.0, %v675_v48  ;;  %v781_v38 = vsel %vm403_vm1, %v780_v17, %v777_v57  ;;  %v535_v44 = vsel %vm403_vm1, %v534_v33, %v533_v19  ;;  %v549_v48 = vrot.slane %v543_v20, 7 }
  0xec   : > { %v684_v5 = vmul.f32 %v683_v40, %v1608_v58  ;;  %v1628_v37 = vmul.f32 %v694_v51, %v1608_v58  ;;  %v539_v40 = vrot.slane %v533_v19, 7  ;;  %v1633_v41 = vsel %vm1587_vm3, 0.0, %v423_v16  ;;  %v413_v56 = vpop.permute.xlu0 %412 }
  0xed   : > { %v785_v43 = vsel %vm367_vm0, %v781_v38, %v783_v29  ;;  %v545_v47 = vsel %vm403_vm1, %v544_v36, %v543_v20  ;;  %v536_v52 = vrot.slane %v535_v44, 6  ;;  %v787_v62 = vpop.permute.xlu1 %786  ;;  %v432_v57 = vmul.f32 %v431_v14, %v1633_v41 }
  0xee   : > { %v1635_v42 = vadd.f32 %v687_v50, %v684_v5  ;;  %v546_v51 = vrot.slane %v545_v47, 6  ;;  %v443_v63 = vmul.f32 %v442_v15, %v1633_v41  ;;  %v797_v50 = vrot.slane %v785_v43, 1 }
  0xef   : > { %v414_v2 = vrot.slane %v413_v56, 6  ;;  %v419_v5 = vrot.slane %v413_v56, 7  ;;  %v788_v8 = vrot.slane %v787_v62, 6  ;;  %v537_v11 = vsel %vm403_vm1, %v536_v52, %v533_v19 }
  0xf0   : > { %v547_v16 = vsel %vm403_vm1, %v546_v51, %v543_v20  ;;  %v793_v17 = vrot.slane %v787_v62, 7  ;;  %v447_v29 = vadd.f32 %v1535_v22, %v443_v63  ;;  %v541_v33 = vsel %vm367_vm0, %v537_v11, %v539_v40  ;;  %v665_v43 = vpop.permute.xlu0 %664 }
  0xf1   : > { %v551_v14 = vsel %vm370_vm4, %v547_v16, %v549_v48  ;;  %v415_v36 = vsel %vm403_vm1, %v414_v2, %v413_v56  ;;  %v789_v15 = vsel %vm403_vm1, %v788_v8, %v787_v62  ;;  %v553_v20 = vrot.slane %v541_v33, 1 }
  0xf2   : > { %v557_v22 = vrot.slane %v551_v14, 1  ;;  %v416_v38 = vrot.slane %v415_v36, 6  ;;  %v790_v40 = vrot.slane %v789_v15, 6  ;;  %v666_v44 = vrot.slane %v665_v43, 6 }
  0xf3   : > { %v671_v47 = vrot.slane %v665_v43, 7  ;;  %v436_v48 = vadd.f32 %v1538_v23, %v432_v57  ;;  %v1667_v52 = vsel %vm1587_vm3, 0.0, %v797_v50  ;;  %v555_v63 = vsel %vm1587_vm3, 0.0, %v553_v20 }
  0xf4   : > { %v417_v10 = vsel %vm403_vm1, %v416_v38, %v413_v56  ;;  %v791_v51 = vsel %vm403_vm1, %v790_v40, %v787_v62  ;;  %v559_v2 = vsel %vm1660_vm6, 0.0, %v557_v22  ;;  %v667_v50 = vsel %vm403_vm1, %v666_v44, %v665_v43 }
  0xf5   : > { %v421_v23 = vsel %vm370_vm4, %v417_v10, %v419_v5  ;;  %v795_v57 = vsel %vm370_vm4, %v791_v51, %v793_v17  ;;  %v569_v56 = vmul.f32 %v568_v31, %v559_v2  ;;  %v668_v45 = vrot.slane %v667_v50, 6 }
  0xf6   : > { %v427_v62 = vrot.slane %v421_v23, 1  ;;  %v801_v8 = vrot.slane %v795_v57, 1  ;;  %v573_v11 = vmul.f32 %v572_v21, %v555_v63  ;;  %v580_v5 = vmul.f32 %v579_v34, %v559_v2 }
  0xf7   : > { %v562_v16 = vmul.f32 %v561_v18, %v555_v63  ;;  %v806_v17 = vmul.f32 %v805_v26, %v1667_v52  ;;  %v817_v31 = vmul.f32 %v816_v28, %v1667_v52  ;;  %v669_v33 = vsel %vm403_vm1, %v668_v45, %v665_v43 }
  0xf8   : > { %v577_v14 = vadd.f32 %v1558_v32, %v573_v11  ;;  %v429_v21 = vsel %vm1660_vm6, 0.0, %v427_v62  ;;  %v803_v34 = vsel %vm1660_vm6, 0.0, %v801_v8  ;;  %v673_v18 = vsel %vm370_vm4, %v669_v33, %v671_v47 }
  0xf9   : > { %v566_v26 = vadd.f32 %v1554_v30, %v562_v16  ;;  %v439_v28 = vmul.f32 %v438_v46, %v429_v21  ;;  %v450_v36 = vmul.f32 %v449_v49, %v429_v21  ;;  %v679_v32 = vrot.slane %v673_v18, 1 }
  0xfa   : > { %v581_v15 = vadd.f32 %v580_v5, %v577_v14  ;;  %v810_v20 = vadd.f32 %v1546_v27, %v806_v17  ;;  %v813_v22 = vmul.f32 %v812_v3, %v803_v34  ;;  %v821_v46 = vadd.f32 %v1566_v35, %v817_v31 }
  0xfb   : > { %v1718_v38 = vadd.f32 %v569_v56, %v566_v26  ;;  %v451_v40 = vadd.f32 %v450_v36, %v447_v29  ;;  %v1720_v30 = vadd.f32 %v439_v28, %v436_v48  ;;  %v824_v27 = vmul.f32 %v823_v12, %v803_v34 }
  0xfc   : > { %582 = vrot.lane.b32.xlu1 %v581_v15, %s1265_s3  ;;  %v1724_v49 = vadd.f32 %v813_v22, %v810_v20  ;;  %v681_v3 = vsel %vm1660_vm6, 0.0, %v679_v32  ;;  %v599_v29 = vmul.f32 %v598_v54, %v555_v63  ;;  %v699_v35 = vadd.f32 %v1598_v53, %v1628_v37  ;;  %v373_v32 = vld [vmem:[%s1850_s2] sm:$0x3] }
  0xfd   : > { %452 = vrot.lane.b32.xlu0 %v451_v40, %s1265_s3  ;;  %v691_v43 = vmul.f32 %v690_v13, %v681_v3  ;;  %v702_v44 = vmul.f32 %v701_v24, %v681_v3  ;;  %v473_v47 = vmul.f32 %v472_v59, %v1633_v41  ;;  %v825_v12 = vadd.f32 %v824_v27, %v821_v46 }
  0xfe   : > { %v606_v19 = vmul.f32 %v605_v6, %v559_v2  ;;  %v720_v54 = vstv %s1682_s0  ;;  %v723_v48 = vstv %s1686_s4  ;;  %v480_v13 = vmul.f32 %v479_v25, %v429_v21 }
  0xff   : > { %v1753_v53 = vadd.f32 %v691_v43, %v1635_v42  ;;  %v703_v59 = vadd.f32 %v702_v44, %v699_v35  ;;  %v849_v24 = vstv %s1698_s19  ;;  %v603_v6 = vadd.f32 %v1602_v55, %v599_v29 }
 0x100   : > { %826 = vrot.lane.b32.xlu1 %v825_v12, %s1265_s3  ;;  %v843_v37 = vmul.f32 %v842_v0, %v1667_v52  ;;  %v846_v41 = vmul.f32 %v845_v1, %v1463_v4  ;;  %v727_v25 = vstv %s1706_s8  ;;  %v477_v7 = vadd.f32 %v1612_v60, %v473_v47 }
 0x101   : > { %704 = vrot.lane.b32.xlu0 %v703_v59, %s1265_s3  ;;  %v721_v42 = vmul.f32 %v720_v54, %v1608_v58  ;;  %v724_v10 = vmul.f32 %v723_v48, %v1447_v39  ;;  %v607_v61 = vadd.f32 %v606_v19, %v603_v6  ;;  %v850_v51 = vmul.f32 %v849_v24, %v803_v34  ;;  %v372_v58 = vld [vmem:[%s1849_s1] sm:$0x3] }
 0x102   : > { %v481_v63 = vadd.f32 %v480_v13, %v477_v7  ;;  %v728_v2 = vmul.f32 %v727_v25, %v681_v3  ;;  %v847_v55 = vadd.f32 %v846_v41, %v843_v37  ;;  %v464_v50 = vrot.slane %v372_v58, 7 }
 0x103   : > { %v725_v0 = vadd.f32 %v724_v10, %v721_v42  ;;  %v494_v47 = vrot.slane %v373_v32, 7  ;;  %v624_v48 = vstv %s1785_s11 }
 0x104   : > { %608 = vrot.lane.b32.xlu1 %v607_v61, %s1266_s24  ;;  %v851_v52 = vadd.f32 %v850_v51, %v847_v55 }
 0x105   : > { %482 = vrot.lane.b32.xlu0 %v481_v63, %s1266_s24  ;;  %v729_v4 = vadd.f32 %v728_v2, %v725_v0 }
 0x108   : > { %852 = vrot.lane.b32.xlu1 %v851_v52, %s1266_s24 }
 0x109   : > { %730 = vrot.lane.b32.xlu0 %v729_v4, %s1266_s24 }
 0x16e   : > { %v583_v1 = vpop.permute.xlu1 %582 }
 0x16f   : > { %v584_v60 = vrot.slane %v583_v1, 6  ;;  %v453_v39 = vpop.permute.xlu0 %452  ;;  %v589_v45 = vrot.slane %v583_v1, 7 }
 0x170   : > { %v455_v23 = vrot.slane %v453_v39, 6  ;;  %v460_v31 = vrot.slane %v453_v39, 7 }
 0x171   : > { %v585_v57 = vsel %vm403_vm1, %v584_v60, %v583_v1 }
 0x172   : > { %v586_v56 = vrot.slane %v585_v57, 6  ;;  %v456_v62 = vsel %vm403_vm1, %v455_v23, %v453_v39  ;;  %v827_v8 = vpop.permute.xlu1 %826 }
 0x173   : > { %v457_v11 = vrot.slane %v456_v62, 6  ;;  %v828_v5 = vrot.slane %v827_v8, 6  ;;  %v705_v16 = vpop.permute.xlu0 %704  ;;  %v833_v20 = vrot.slane %v827_v8, 7 }
 0x174   : > { %v587_v17 = vsel %vm403_vm1, %v586_v56, %v583_v1  ;;  %v706_v33 = vrot.slane %v705_v16, 6  ;;  %v711_v29 = vrot.slane %v705_v16, 7 }
 0x175   : > { %v591_v14 = vsel %vm454_vm7, %v587_v17, %v589_v45  ;;  %v458_v21 = vsel %vm403_vm1, %v457_v11, %v453_v39  ;;  %v829_v34 = vsel %vm403_vm1, %v828_v5, %v827_v8 }
 0x176   : > { %v592_v18 = vmul.f32 %v591_v14, %v464_v50  ;;  %v462_v26 = vsel %vm454_vm7, %v458_v21, %v460_v31  ;;  %v830_v28 = vrot.slane %v829_v34, 6  ;;  %v707_v36 = vsel %vm403_vm1, %v706_v33, %v705_v16  ;;  %v609_v15 = vpop.permute.xlu1 %608 }
 0x177   : > { %v708_v22 = vrot.slane %v707_v36, 6  ;;  %v610_v40 = vrot.slane %v609_v15, 6  ;;  %v483_v46 = vpop.permute.xlu0 %482  ;;  %v466_v27 = vmul.f32 %v464_v50, %v462_v26  ;;  %v615_v6 = vrot.slane %v609_v15, 7 }
 0x178   : > { %v831_v3 = vsel %vm403_vm1, %v830_v28, %v827_v8  ;;  %v485_v43 = vrot.slane %v483_v46, 6  ;;  %v594_v19 = vrot.slane %v592_v18, 1  ;;  %v490_v61 = vrot.slane %v483_v46, 7 }
 0x179   : > { %v835_v35 = vsel %vm454_vm7, %v831_v3, %v833_v20  ;;  %v709_v44 = vsel %vm403_vm1, %v708_v22, %v705_v16  ;;  %v611_v12 = vsel %vm403_vm1, %v610_v40, %v609_v15  ;;  %v468_v7 = vrot.slane %v466_v27, 1 }
 0x17a   : > { %v713_v54 = vsel %vm454_vm7, %v709_v44, %v711_v29  ;;  %v612_v59 = vrot.slane %v611_v12, 6  ;;  %v853_v13 = vpop.permute.xlu1 %852  ;;  %v836_v24 = vmul.f32 %v835_v35, %v464_v50  ;;  %v486_v37 = vsel %vm403_vm1, %v485_v43, %v483_v46 }
 0x17b   : > { %v854_v41 = vrot.slane %v853_v13, 6  ;;  %v731_v25 = vpop.permute.xlu0 %730  ;;  %v487_v10 = vrot.slane %v486_v37, 6  ;;  %v714_v51 = vmul.f32 %v713_v54, %v464_v50  ;;  %v596_v0 = vadd.f32 %v594_v19, %v1718_v38 }
 0x17c   : > { %v613_v42 = vsel %vm403_vm1, %v612_v59, %v609_v15  ;;  %v732_v55 = vrot.slane %v731_v25, 6  ;;  %v838_v58 = vrot.slane %v836_v24, 1  ;;  %v859_v39 = vrot.slane %v853_v13, 7 }
 0x17d   : > { %v617_v63 = vsel %vm484_vm8, %v613_v42, %v615_v6  ;;  %v855_v2 = vsel %vm403_vm1, %v854_v41, %v853_v13  ;;  %v488_v4 = vsel %vm403_vm1, %v487_v10, %v483_v46  ;;  %v470_v38 = vadd.f32 %v468_v7, %v1720_v30 }
 0x17e   : > { %v618_v52 = vmul.f32 %v617_v63, %v494_v47  ;;  %v856_v1 = vrot.slane %v855_v2, 6  ;;  %v492_v60 = vsel %vm484_vm8, %v488_v4, %v490_v61  ;;  %v733_v23 = vsel %vm403_vm1, %v732_v55, %v731_v25 }
 0x17f   : > { %v496_v50 = vmul.f32 %v494_v47, %v492_v60  ;;  %v734_v62 = vrot.slane %v733_v23, 6  ;;  %v716_v8 = vrot.slane %v714_v51, 1  ;;  %v737_v11 = vrot.slane %v731_v25, 7 }
 0x180   : > { %v620_v57 = vrot.slane %v618_v52, 1  ;;  %v857_v56 = vsel %vm403_vm1, %v856_v1, %v853_v13  ;;  %v502_v33 = vstv %s1807_s13  ;;  %v840_v14 = vadd.f32 %v838_v58, %v1724_v49 }
 0x181   : > { %v861_v45 = vsel %vm484_vm8, %v857_v56, %v859_v39  ;;  %v498_v16 = vrot.slane %v496_v50, 1  ;;  %v735_v31 = vsel %vm403_vm1, %v734_v62, %v731_v25  ;;  %v868_v28 = vstv %s1813_s14 }
 0x182   : > { %v622_v5 = vadd.f32 %v620_v57, %v596_v0  ;;  %v862_v17 = vmul.f32 %v861_v45, %v494_v47  ;;  %v739_v21 = vsel %vm484_vm8, %v735_v31, %v737_v11  ;;  %v718_v36 = vadd.f32 %v716_v8, %v1753_v53 }
 0x183   : > { %v500_v34 = vadd.f32 %v498_v16, %v470_v38  ;;  %v740_v26 = vmul.f32 %v739_v21, %v494_v47  ;;  %v746_v40 = vstv %s1820_s15 }
 0x184   : > { %v625_v30 = vadd.f32 %v624_v48, %v622_v5  ;;  %v864_v18 = vrot.slane %v862_v17, 1 }
 0x185   : > { %v503_v15 = vadd.f32 %v502_v33, %v500_v34  ;;  %v742_v22 = vrot.slane %v740_v26, 1 }
 0x186   : > { %v626_v32 = vmax.f32 %v625_v30, 0.0  ;;  %v866_v20 = vadd.f32 %v864_v18, %v840_v14 }
 0x187   : > { %v504_v49 = vmax.f32 %v503_v15, 0.0  ;;  %v744_v9 = vadd.f32 %v742_v22, %v718_v36 }
 0x188   : > { %1049 = vst [vmem:[%s1750_s29 + $0xa] sm:$0x3] %v626_v32  ;;  %v869_v46 = vadd.f32 %v868_v28, %v866_v20 }
 0x189   : > { %1029 = vst [vmem:[%s1750_s29 + $0x8] sm:$0x3] %v504_v49  ;;  %v747_v3 = vadd.f32 %v746_v40, %v744_v9 }
 0x18a   : > { %v870_v27 = vmax.f32 %v869_v46, 0.0 }
 0x18b   : > { %v748_v29 = vmax.f32 %v747_v3, 0.0 }
 0x18c   : > { %1089 = vst [vmem:[%s1750_s29 + $0xe] sm:$0x3] %v870_v27 }
 0x18d   : > { %1069 = vst [vmem:[%s1750_s29 + $0xc] sm:$0x3] %v748_v29 }
 0x18e PF: > { %s20_s26 = sadd.s32 1, %s1257_s26   ;;  %s1882_s24 = sld [smem:[#allocation12_spill]] }
 0x18f   : > { %p17_p8 = scmp.ge.s32.totalorder %s20_s26, 4   ;;  %s1883_s25 = sld [smem:[#allocation13_spill]] }
 0x191   :  { %19 = sbr.rel (!%p17_p8) target bundleno = 10 (0xa), region = 105 }
 0x198   :  { %900 = vsyncpa [#allocation3], 1 }
 0x199   :  { %902 = vsyncpa [#allocation3 + $0x1], 1 }
 0x19a   :  { %903 = vsyncpa [#allocation5], 1 }
 0x19b   :  { %904 = vsyncpa [#allocation8], 1 }

</bundles_post_ra>
